<compile_context>
chip_gen: v5e
topology: v5e:2x2
jax: 0.10.0
libtpu: 0.0.40
codegen_flags: <defaults>
</compile_context>

<pallas_src>
import numpy as np
import jax
import jax.numpy as jnp
from jax.experimental import pallas as pl
from jax.experimental.pallas import tpu as pltpu


def subgcn_kernel(kcnt_ref, scol_ref, xrow_ref, pcol_ref,
                  x_ref, s_ref, w_ref, b_ref, p_ref,
                  out_ref, hbuf, acc):
    # kcnt_ref: [nkt]            i32   #nonzero S column-tiles per row tile (SMEM)
    # scol_ref: [nkt, kmax]      i32   their column-tile ids (padded by repeating last)
    # xrow_ref/pcol_ref: gating tables, consumed only by the index_maps
    # x_ref:  [TILE, Cpad]  bf16   X block for the current contraction tile (hop 0)
    # s_ref:  [TILE, TILE]  bf16   nonzero block of the normalized adjacency
    # w_ref:  [Cpad, Hpad]  bf16   linear weight (resident)
    # b_ref:  [1, Hpad]     f32    linear bias   (resident)
    # p_ref:  [Gpad, TILE]  bf16   mean-pool panel for this row tile (hop 2)
    # out_ref:[Gpad, Hpad]  f32    pooled output (resident accumulator)
    # hbuf:   [2*nkt, TILE, Cpad] bf16  ping-pong propagated features (scratch)
    # acc:    [TILE, Cpad]  f32    per-row-tile accumulator (scratch)
    step = pl.program_id(0)          # propagation hop 0..2
    i = pl.program_id(1)             # row tile of S
    k = pl.program_id(2)             # position in this row tile's nonzero-column list
    nk = pl.num_programs(2)
    nkt = hbuf.shape[0] // 2

    kcnt = kcnt_ref[i]               # number of valid (nonzero) S blocks in this row
    kt = scol_ref[i, k]              # actual column-tile index for this grid step

    # Very first grid point: zero the resident pooled-output accumulator.
    @pl.when((step == 0) & (i == 0) & (k == 0))
    def _():
        out_ref[...] = jnp.zeros_like(out_ref)

    # Start of each row tile's contraction: reset the f32 accumulator.
    @pl.when(k == 0)
    def _():
        acc[...] = jnp.zeros_like(acc)

    # acc += S[i, kt] @ h[kt]   (entries with k >= kcnt are padding -> skipped).
    # Hop 0 reads X straight from its pipelined block; hops 1/2 read the ping-pong
    # feature buffer written by the previous hop.
    @pl.when((k < kcnt) & (step == 0))
    def _():
        acc[...] += jnp.dot(s_ref[...], x_ref[...],
                            preferred_element_type=jnp.float32)

    @pl.when((k < kcnt) & (step > 0))
    def _():
        rbuf = jax.lax.rem(step + 1, 2)      # hop 1 reads half 0, hop 2 reads half 1
        acc[...] += jnp.dot(s_ref[...], hbuf[rbuf * nkt + kt],
                            preferred_element_type=jnp.float32)

    @pl.when(k == nk - 1)
    def _():
        # Hops 0/1: store propagated rows into the other ping-pong half.
        @pl.when(step < 2)
        def _():
            wbuf = jax.lax.rem(step, 2)
            hbuf[wbuf * nkt + i] = acc[...].astype(hbuf.dtype)

        # Hop 2: fused epilogue (linear + bias + ReLU + mean pool) for this row tile.
        @pl.when(step == 2)
        def _():
            lin = jnp.dot(acc[...].astype(jnp.bfloat16), w_ref[...],
                          preferred_element_type=jnp.float32) + b_ref[...]
            h_act = jnp.maximum(lin, 0.0).astype(jnp.bfloat16)
            out_ref[...] += jnp.dot(p_ref[...], h_act,
                                    preferred_element_type=jnp.float32)


def _round_up(v, m):
    return ((v + m - 1) // m) * m


def sub_gcn_feature(x, edge_index, batch, weight, bias, num_graphs):
    """x: [N, C_in] f32, edge_index: [2, E] i32, batch: [N] i32,
    weight: [C_in, hidden] (x @ W layout), bias: [hidden].

    Note: the block-sparsity pattern of S is concretized on the host (it sizes the
    grid), so call this wrapper eagerly (outside jit)."""
    n, c_in = x.shape
    hidden = weight.shape[1]

    # ---- tile / padded sizes ----
    # 256-aligned S tiles capped at 2048: S double-buffer (16 MiB) + acc (1 MiB) +
    # hbuf fit comfortably in v7x's 64 MiB VMEM while keeping per-step grid overhead
    # negligible vs. the S DMA.  (On v5e/v6e one could go to 4096.)
    tile = min(2048, _round_up(max(n, 1), 256))
    npad = _round_up(n, tile)
    cpad = _round_up(c_in, 128)
    hpad = _round_up(hidden, 128)
    gpad = _round_up(num_graphs, 8)
    nkt = npad // tile

    # ---- glue: S = D^-1/2 (A + I) D^-1/2 (gcn_norm with self-loops) ----
    # Diagonal is .set(1.0) (not + eye) so pre-existing self-loops in edge_index
    # don't become 2.0; .set also dedups parallel edges.
    src, dst = edge_index[0], edge_index[1]
    a = jnp.zeros((n, n), jnp.float32).at[dst, src].set(1.0)
    a = a.at[jnp.arange(n), jnp.arange(n)].set(1.0)
    deg = a.sum(axis=1)
    dinv = jnp.where(deg > 0, jax.lax.rsqrt(deg), 0.0)
    s_norm = (a * dinv[:, None] * dinv[None, :]).astype(jnp.bfloat16)
    s_pad = jnp.zeros((npad, npad), jnp.bfloat16).at[:n, :n].set(s_norm)

    # ---- block-sparsity of S (batched disjoint graphs -> block-diagonal) ----
    # For every row tile i, list the column tiles whose (tile x tile) block of S is
    # nonzero; the kernel's k axis only walks this list.
    blk_nz = np.asarray(jax.device_get(
        (s_pad.reshape(nkt, tile, nkt, tile) != 0).any(axis=(1, 3))))
    kmax = max(1, int(blk_nz.sum(axis=1).max()))
    kcounts = np.zeros((nkt,), np.int32)
    s_cols = np.zeros((nkt, kmax), np.int32)
    for i in range(nkt):
        ids = np.nonzero(blk_nz[i])[0].astype(np.int32)
        kcounts[i] = ids.size
        if ids.size:
            s_cols[i, :ids.size] = ids
            s_cols[i, ids.size:] = ids[-1]   # repeat last valid id -> no extra DMA
    # Gating tables for the other streamed operands: X blocks are only needed on
    # hop 0, P panels only on hop 2 (constant index otherwise -> no re-fetch).
    x_rows = np.zeros((3, nkt, kmax), np.int32)
    x_rows[0] = s_cols
    p_cols = np.zeros((3, nkt), np.int32)
    p_cols[2] = np.arange(nkt, dtype=np.int32)

    kcounts = jnp.asarray(kcounts)
    s_cols = jnp.asarray(s_cols)
    x_rows = jnp.asarray(x_rows)
    p_cols = jnp.asarray(p_cols)

    # ---- glue: mean-pool matrix P[g, n] = (batch[n]==g) / count[g] ----
    onehot = (batch[None, :] == jnp.arange(num_graphs)[:, None]).astype(jnp.float32)
    counts = jnp.maximum(onehot.sum(axis=1, keepdims=True), 1.0)
    p_pad = jnp.zeros((gpad, npad), jnp.bfloat16).at[:num_graphs, :n].set(
        (onehot / counts).astype(jnp.bfloat16))

    x_pad = jnp.zeros((npad, cpad), jnp.bfloat16).at[:n, :c_in].set(x.astype(jnp.bfloat16))
    w_pad = jnp.zeros((cpad, hpad), jnp.bfloat16).at[:c_in, :hidden].set(
        weight.astype(jnp.bfloat16))
    b_pad = jnp.zeros((1, hpad), jnp.float32).at[0, :hidden].set(bias.astype(jnp.float32))

    grid = (3, nkt, kmax)

    out_pad = pl.pallas_call(
        subgcn_kernel,
        out_shape=jax.ShapeDtypeStruct((gpad, hpad), jnp.float32),
        grid_spec=pltpu.PrefetchScalarGridSpec(
            num_scalar_prefetch=4,
            grid=grid,
            in_specs=[
                # X: fetched only on hop 0 (table maps hops 1-2 to block 0).
                pl.BlockSpec((tile, cpad),
                             lambda s, i, k, kc, sc, xr, pc: (xr[s, i, k], 0)),
                # S: only the nonzero blocks of row tile i are ever streamed.
                pl.BlockSpec((tile, tile),
                             lambda s, i, k, kc, sc, xr, pc: (i, sc[i, k])),
                pl.BlockSpec((cpad, hpad), lambda s, i, k, kc, sc, xr, pc: (0, 0)),  # W
                pl.BlockSpec((1, hpad),    lambda s, i, k, kc, sc, xr, pc: (0, 0)),  # bias
                # P: fetched only on hop 2 (one panel per row tile).
                pl.BlockSpec((gpad, tile),
                             lambda s, i, k, kc, sc, xr, pc: (0, pc[s, i])),
            ],
            out_specs=pl.BlockSpec((gpad, hpad), lambda s, i, k, kc, sc, xr, pc: (0, 0)),
            scratch_shapes=[
                pltpu.VMEM((2 * nkt, tile, cpad), jnp.bfloat16),  # ping-pong features
                pltpu.VMEM((tile, cpad), jnp.float32),            # f32 row-tile accumulator
            ],
        ),
        compiler_params=pltpu.CompilerParams(
            # The three hops chain through the resident hbuf scratch, so every grid
            # axis carries a dependency -> no megacore split of this grid.
            # TODO(synk): v7x-only follow-ups: partition row tiles (graphs) across the
            # two TensorCores and/or store S in fp8 after re-validating accuracy.
            dimension_semantics=("arbitrary", "arbitrary", "arbitrary"),
            vmem_limit_bytes=48 * 1024 * 1024,
        ),
    )(kcounts, s_cols, x_rows, p_cols, x_pad, s_pad, w_pad, b_pad, p_pad)

    return out_pad[:num_graphs, :hidden]


def reference(x, edge_index, batch, weight, bias, num_graphs):
    n = x.shape[0]
    src, dst = edge_index[0], edge_index[1]
    a = jnp.zeros((n, n), jnp.float32).at[dst, src].set(1.0)
    a = a.at[jnp.arange(n), jnp.arange(n)].set(1.0)
    deg = a.sum(axis=1)
    dinv = jnp.where(deg > 0, jax.lax.rsqrt(deg), 0.0)
    s = dinv[:, None] * a * dinv[None, :]
    h = x
    for _ in range(3):
        h = s @ h
    h = jax.nn.relu(h @ weight + bias)
    onehot = (batch[None, :] == jnp.arange(num_graphs)[:, None]).astype(jnp.float32)
    return (onehot @ h) / jnp.maximum(onehot.sum(axis=1, keepdims=True), 1.0)


if __name__ == "__main__":
    key = jax.random.PRNGKey(0)
    k_x, k_w, k_b = jax.random.split(key, 3)

    num_nodes = 16      # N
    c_in = 4            # input node-feature channels
    hidden = 32         # SGConv hidden size
    num_graphs = 2      # 2 graphs of 8 nodes each

    x = jax.random.normal(k_x, (num_nodes, c_in), jnp.float32)
    batch = jnp.concatenate([jnp.zeros(8, jnp.int32), jnp.ones(8, jnp.int32)])

    # undirected ring within each graph of 8 nodes
    edges = []
    for g in range(num_graphs):
        base = g * 8
        for i in range(8):
            u, v = base + i, base + (i + 1) % 8
            edges.append((u, v))
            edges.append((v, u))
    edge_index = jnp.array(edges, jnp.int32).T  # [2, E]

    # deterministic synthetic parameters (stored as [C_in, hidden] for x @ W + b)
    weight = jax.random.normal(k_w, (c_in, hidden), jnp.float32) * 0.1
    bias = jax.random.normal(k_b, (hidden,), jnp.float32) * 0.01

    out = sub_gcn_feature(x, edge_index, batch, weight, bias, num_graphs)
    out = jax.block_until_ready(out)

    ref = reference(x, edge_index, batch, weight, bias, num_graphs)
    assert out.shape == (num_graphs, hidden)
    # bf16 inputs with f32 accumulation: loosen tolerance vs the f32 reference.
    assert jnp.allclose(out, ref, atol=3e-2, rtol=3e-2)

    print("KERNEL_OK")
</pallas_src>

<mosaic_0001>
module attributes {stable_mosaic.version = 11 : i64} {
  func.func @subgcn_kernel(%arg0: i32, %arg1: i32, %arg2: i32, %arg3: memref<1xi32, #tpu.memory_space<smem>>, %arg4: memref<1x1xi32, #tpu.memory_space<smem>>, %arg5: memref<3x1x1xi32, #tpu.memory_space<smem>>, %arg6: memref<3x1xi32, #tpu.memory_space<smem>>, %arg7: memref<256x128xbf16, #tpu.memory_space<vmem>>, %arg8: memref<256x256xbf16, #tpu.memory_space<vmem>>, %arg9: memref<128x128xbf16, #tpu.memory_space<vmem>>, %arg10: memref<1x128xf32, #tpu.memory_space<vmem>>, %arg11: memref<8x256xbf16, #tpu.memory_space<vmem>>, %arg12: memref<8x128xf32, #tpu.memory_space<vmem>>, %arg13: memref<2x256x128xbf16, #tpu.memory_space<vmem>>, %arg14: memref<256x128xf32, #tpu.memory_space<vmem>>) attributes {dimension_semantics = [#tpu.dimension_semantics<arbitrary>, #tpu.dimension_semantics<arbitrary>, #tpu.dimension_semantics<arbitrary>], iteration_bounds = array<i64: 3, 1, 1>, scalar_prefetch = 4 : i64, scratch_operands = 2 : i64, tpu.core_type = #tpu.core_type<tc>, window_params = [{transform_indices = @transform_0, window_bounds = array<i64: 256, 128>}, {transform_indices = @transform_1, window_bounds = array<i64: 256, 256>}, {pipeline_mode = #tpu.pipeline_mode<synchronous>, transform_indices = @transform_2, window_bounds = array<i64: 128, 128>}, {pipeline_mode = #tpu.pipeline_mode<synchronous>, transform_indices = @transform_3, window_bounds = array<i64: 1, 128>}, {transform_indices = @transform_4, window_bounds = array<i64: 8, 256>}, {pipeline_mode = #tpu.pipeline_mode<synchronous>, transform_indices = @transform_5, window_bounds = array<i64: 8, 128>}]} {
    %0 = arith.index_cast %arg1 : i32 to index
    %1 = memref.load %arg3[%0] : memref<1xi32, #tpu.memory_space<smem>>
    %2 = arith.index_cast %arg1 : i32 to index
    %3 = arith.index_cast %arg2 : i32 to index
    %4 = memref.load %arg4[%2, %3] : memref<1x1xi32, #tpu.memory_space<smem>>
    %c0_i32 = arith.constant 0 : i32
    %5 = arith.cmpi eq, %arg0, %c0_i32 : i32
    %c0_i32_0 = arith.constant 0 : i32
    %6 = arith.cmpi eq, %arg1, %c0_i32_0 : i32
    %7 = arith.andi %5, %6 : i1
    %c0_i32_1 = arith.constant 0 : i32
    %8 = arith.cmpi eq, %arg2, %c0_i32_1 : i32
    %9 = arith.andi %7, %8 : i1
    %10 = arith.extui %9 : i1 to i32
    %c0_i32_2 = arith.constant 0 : i32
    %11 = arith.cmpi ne, %10, %c0_i32_2 : i32
    scf.if %11 {
      %cst = arith.constant 0.000000e+00 : f32
      %28 = vector.broadcast %cst : f32 to vector<8x128xf32>
      %c0 = arith.constant 0 : index
      %c0_11 = arith.constant 0 : index
      %29 = vector.load %arg12[%c0, %c0_11] : memref<8x128xf32, #tpu.memory_space<vmem>>, vector<8x128xf32>
      tpu.vector_store %arg12[%c0, %c0_11], %28 {strides = array<i32>} : memref<8x128xf32, #tpu.memory_space<vmem>>, vector<8x128xf32>,
    } else {
    }
    %c0_i32_3 = arith.constant 0 : i32
    %12 = arith.cmpi eq, %arg2, %c0_i32_3 : i32
    %13 = arith.extui %12 : i1 to i32
    %c0_i32_4 = arith.constant 0 : i32
    %14 = arith.cmpi ne, %13, %c0_i32_4 : i32
    scf.if %14 {
      %cst = arith.constant 0.000000e+00 : f32
      %28 = vector.broadcast %cst : f32 to vector<256x128xf32>
      %c0 = arith.constant 0 : index
      %c0_11 = arith.constant 0 : index
      %29 = vector.load %arg14[%c0, %c0_11] : memref<256x128xf32, #tpu.memory_space<vmem>>, vector<256x128xf32>
      tpu.vector_store %arg14[%c0, %c0_11], %28 {strides = array<i32>} : memref<256x128xf32, #tpu.memory_space<vmem>>, vector<256x128xf32>,
    } else {
    }
    %15 = arith.cmpi slt, %arg2, %1 : i32
    %c0_i32_5 = arith.constant 0 : i32
    %16 = arith.cmpi eq, %arg0, %c0_i32_5 : i32
    %17 = arith.andi %15, %16 : i1
    %18 = arith.extui %17 : i1 to i32
    %c0_i32_6 = arith.constant 0 : i32
    %19 = arith.cmpi ne, %18, %c0_i32_6 : i32
    scf.if %19 {
      %c0 = arith.constant 0 : index
      %c0_11 = arith.constant 0 : index
      %28 = vector.load %arg14[%c0, %c0_11] : memref<256x128xf32, #tpu.memory_space<vmem>>, vector<256x128xf32>
      %c0_12 = arith.constant 0 : index
      %c0_13 = arith.constant 0 : index
      %29 = vector.load %arg8[%c0_12, %c0_13] : memref<256x256xbf16, #tpu.memory_space<vmem>>, vector<256x256xbf16>
      %c0_14 = arith.constant 0 : index
      %c0_15 = arith.constant 0 : index
      %30 = vector.load %arg7[%c0_14, %c0_15] : memref<256x128xbf16, #tpu.memory_space<vmem>>, vector<256x128xbf16>
      %cst = arith.constant dense<0.000000e+00> : vector<256x128xf32>
      %31 = tpu.matmul %29, %30, %cst {dimension_numbers = #tpu.dot_dimension_numbers<[1], [0], [0], [1], [0, 0, 1, 1], [], []>} : vector<256x256xbf16>, vector<256x128xbf16>, vector<256x128xf32> -> vector<256x128xf32>
      %32 = arith.addf %28, %31 : vector<256x128xf32>
      %c0_16 = arith.constant 0 : index
      %c0_17 = arith.constant 0 : index
      %33 = vector.load %arg14[%c0_16, %c0_17] : memref<256x128xf32, #tpu.memory_space<vmem>>, vector<256x128xf32>
      tpu.vector_store %arg14[%c0_16, %c0_17], %32 {strides = array<i32>} : memref<256x128xf32, #tpu.memory_space<vmem>>, vector<256x128xf32>,
    } else {
    }
    %20 = arith.cmpi slt, %arg2, %1 : i32
    %c0_i32_7 = arith.constant 0 : i32
    %21 = arith.cmpi sgt, %arg0, %c0_i32_7 : i32
    %22 = arith.andi %20, %21 : i1
    %23 = arith.extui %22 : i1 to i32
    %c0_i32_8 = arith.constant 0 : i32
    %24 = arith.cmpi ne, %23, %c0_i32_8 : i32
    scf.if %24 {
      %c1_i32 = arith.constant 1 : i32
      %28 = arith.addi %arg0, %c1_i32 : i32
      %c2_i32 = arith.constant 2 : i32
      %29 = arith.remsi %28, %c2_i32 : i32
      %c0 = arith.constant 0 : index
      %c0_11 = arith.constant 0 : index
      %30 = vector.load %arg14[%c0, %c0_11] : memref<256x128xf32, #tpu.memory_space<vmem>>, vector<256x128xf32>
      %c0_12 = arith.constant 0 : index
      %c0_13 = arith.constant 0 : index
      %31 = vector.load %arg8[%c0_12, %c0_13] : memref<256x256xbf16, #tpu.memory_space<vmem>>, vector<256x256xbf16>
      %c1_i32_14 = arith.constant 1 : i32
      %32 = arith.muli %29, %c1_i32_14 : i32
      %33 = arith.addi %32, %4 : i32
      %34 = arith.index_cast %33 : i32 to index
      %c0_15 = arith.constant 0 : index
      %c0_16 = arith.constant 0 : index
      %35 = vector.load %arg13[%34, %c0_15, %c0_16] : memref<2x256x128xbf16, #tpu.memory_space<vmem>>, vector<1x256x128xbf16>
      %36 = vector.shape_cast %35 : vector<1x256x128xbf16> to vector<256x128xbf16>
      %cst = arith.constant dense<0.000000e+00> : vector<256x128xf32>
      %37 = tpu.matmul %31, %36, %cst {dimension_numbers = #tpu.dot_dimension_numbers<[1], [0], [0], [1], [0, 0, 1, 1], [], []>} : vector<256x256xbf16>, vector<256x128xbf16>, vector<256x128xf32> -> vector<256x128xf32>
      %38 = arith.addf %30, %37 : vector<256x128xf32>
      %c0_17 = arith.constant 0 : index
      %c0_18 = arith.constant 0 : index
      %39 = vector.load %arg14[%c0_17, %c0_18] : memref<256x128xf32, #tpu.memory_space<vmem>>, vector<256x128xf32>
      tpu.vector_store %arg14[%c0_17, %c0_18], %38 {strides = array<i32>} : memref<256x128xf32, #tpu.memory_space<vmem>>, vector<256x128xf32>,
    } else {
    }
    %c0_i32_9 = arith.constant 0 : i32
    %25 = arith.cmpi eq, %arg2, %c0_i32_9 : i32
    %26 = arith.extui %25 : i1 to i32
    %c0_i32_10 = arith.constant 0 : i32
    %27 = arith.cmpi ne, %26, %c0_i32_10 : i32
    scf.if %27 {
      %c2_i32 = arith.constant 2 : i32
      %28 = arith.cmpi slt, %arg0, %c2_i32 : i32
      %29 = arith.extui %28 : i1 to i32
      %c0_i32_11 = arith.constant 0 : i32
      %30 = arith.cmpi ne, %29, %c0_i32_11 : i32
      scf.if %30 {
        %c2_i32_14 = arith.constant 2 : i32
        %34 = arith.remsi %arg0, %c2_i32_14 : i32
        %c0 = arith.constant 0 : index
        %c0_15 = arith.constant 0 : index
        %35 = vector.load %arg14[%c0, %c0_15] : memref<256x128xf32, #tpu.memory_space<vmem>>, vector<256x128xf32>
        %36 = arith.truncf %35 : vector<256x128xf32> to vector<256x128xbf16>
        %c1_i32 = arith.constant 1 : i32
        %37 = arith.muli %34, %c1_i32 : i32
        %38 = arith.addi %37, %arg1 : i32
        %39 = arith.index_cast %38 : i32 to index
        %c0_16 = arith.constant 0 : index
        %c0_17 = arith.constant 0 : index
        %40 = vector.load %arg13[%39, %c0_16, %c0_17] : memref<2x256x128xbf16, #tpu.memory_space<vmem>>, vector<1x256x128xbf16>
        %41 = vector.shape_cast %40 : vector<1x256x128xbf16> to vector<256x128xbf16>
        %42 = vector.shape_cast %36 : vector<256x128xbf16> to vector<1x256x128xbf16>
        tpu.vector_store %arg13[%39, %c0_16, %c0_17], %42 {strides = array<i32>} : memref<2x256x128xbf16, #tpu.memory_space<vmem>>, vector<1x256x128xbf16>,
      } else {
      }
      %c2_i32_12 = arith.constant 2 : i32
      %31 = arith.cmpi eq, %arg0, %c2_i32_12 : i32
      %32 = arith.extui %31 : i1 to i32
      %c0_i32_13 = arith.constant 0 : i32
      %33 = arith.cmpi ne, %32, %c0_i32_13 : i32
      scf.if %33 {
        %c0 = arith.constant 0 : index
        %c0_14 = arith.constant 0 : index
        %34 = vector.load %arg14[%c0, %c0_14] : memref<256x128xf32, #tpu.memory_space<vmem>>, vector<256x128xf32>
        %35 = arith.truncf %34 : vector<256x128xf32> to vector<256x128xbf16>
        %c0_15 = arith.constant 0 : index
        %c0_16 = arith.constant 0 : index
        %36 = vector.load %arg9[%c0_15, %c0_16] : memref<128x128xbf16, #tpu.memory_space<vmem>>, vector<128x128xbf16>
        %cst = arith.constant dense<0.000000e+00> : vector<256x128xf32>
        %37 = tpu.matmul %35, %36, %cst {dimension_numbers = #tpu.dot_dimension_numbers<[1], [0], [0], [1], [0, 0, 1, 1], [], []>} : vector<256x128xbf16>, vector<128x128xbf16>, vector<256x128xf32> -> vector<256x128xf32>
        %c0_17 = arith.constant 0 : index
        %c0_18 = arith.constant 0 : index
        %38 = vector.load %arg10[%c0_17, %c0_18] : memref<1x128xf32, #tpu.memory_space<vmem>>, vector<1x128xf32>
        %39 = vector.broadcast %38 : vector<1x128xf32> to vector<256x128xf32>
        %40 = arith.addf %37, %39 : vector<256x128xf32>
        %cst_19 = arith.constant 0.000000e+00 : f32
        %41 = vector.broadcast %cst_19 : f32 to vector<256x128xf32>
        %42 = arith.maximumf %40, %41 : vector<256x128xf32>
        %43 = arith.truncf %42 : vector<256x128xf32> to vector<256x128xbf16>
        %c0_20 = arith.constant 0 : index
        %c0_21 = arith.constant 0 : index
        %44 = vector.load %arg12[%c0_20, %c0_21] : memref<8x128xf32, #tpu.memory_space<vmem>>, vector<8x128xf32>
        %c0_22 = arith.constant 0 : index
        %c0_23 = arith.constant 0 : index
        %45 = vector.load %arg11[%c0_22, %c0_23] : memref<8x256xbf16, #tpu.memory_space<vmem>>, vector<8x256xbf16>
        %cst_24 = arith.constant dense<0.000000e+00> : vector<8x128xf32>
        %46 = tpu.matmul %45, %43, %cst_24 {dimension_numbers = #tpu.dot_dimension_numbers<[1], [0], [0], [1], [0, 0, 1, 1], [], []>} : vector<8x256xbf16>, vector<256x128xbf16>, vector<8x128xf32> -> vector<8x128xf32>
        %47 = arith.addf %44, %46 : vector<8x128xf32>
        %c0_25 = arith.constant 0 : index
        %c0_26 = arith.constant 0 : index
        %48 = vector.load %arg12[%c0_25, %c0_26] : memref<8x128xf32, #tpu.memory_space<vmem>>, vector<8x128xf32>
        tpu.vector_store %arg12[%c0_25, %c0_26], %47 {strides = array<i32>} : memref<8x128xf32, #tpu.memory_space<vmem>>, vector<8x128xf32>,
      } else {
      }
    } else {
    }
    return
  }
  func.func @transform_0(%arg0: i32, %arg1: i32, %arg2: i32, %arg3: memref<1xi32, #tpu.memory_space<smem>>, %arg4: memref<1x1xi32, #tpu.memory_space<smem>>, %arg5: memref<3x1x1xi32, #tpu.memory_space<smem>>, %arg6: memref<3x1xi32, #tpu.memory_space<smem>>) -> (i32, i32) {
    %0 = arith.index_cast %arg0 : i32 to index
    %1 = arith.index_cast %arg1 : i32 to index
    %2 = arith.index_cast %arg2 : i32 to index
    %3 = memref.load %arg5[%0, %1, %2] : memref<3x1x1xi32, #tpu.memory_space<smem>>
    %c0_i32 = arith.constant 0 : i32
    %c0_i32_0 = arith.constant 0 : i32
    return %3, %c0_i32 : i32, i32
  }
  func.func @transform_1(%arg0: i32, %arg1: i32, %arg2: i32, %arg3: memref<1xi32, #tpu.memory_space<smem>>, %arg4: memref<1x1xi32, #tpu.memory_space<smem>>, %arg5: memref<3x1x1xi32, #tpu.memory_space<smem>>, %arg6: memref<3x1xi32, #tpu.memory_space<smem>>) -> (i32, i32) {
    %0 = arith.index_cast %arg1 : i32 to index
    %1 = arith.index_cast %arg2 : i32 to index
    %2 = memref.load %arg4[%0, %1] : memref<1x1xi32, #tpu.memory_space<smem>>
    %c0_i32 = arith.constant 0 : i32
    return %arg1, %2 : i32, i32
  }
  func.func @transform_2(%arg0: i32, %arg1: i32, %arg2: i32, %arg3: memref<1xi32, #tpu.memory_space<smem>>, %arg4: memref<1x1xi32, #tpu.memory_space<smem>>, %arg5: memref<3x1x1xi32, #tpu.memory_space<smem>>, %arg6: memref<3x1xi32, #tpu.memory_space<smem>>) -> (i32, i32) {
    %c0_i32 = arith.constant 0 : i32
    %c0_i32_0 = arith.constant 0 : i32
    %c0_i32_1 = arith.constant 0 : i32
    return %c0_i32, %c0_i32_0 : i32, i32
  }
  func.func @transform_3(%arg0: i32, %arg1: i32, %arg2: i32, %arg3: memref<1xi32, #tpu.memory_space<smem>>, %arg4: memref<1x1xi32, #tpu.memory_space<smem>>, %arg5: memref<3x1x1xi32, #tpu.memory_space<smem>>, %arg6: memref<3x1xi32, #tpu.memory_space<smem>>) -> (i32, i32) {
    %c0_i32 = arith.constant 0 : i32
    %c0_i32_0 = arith.constant 0 : i32
    %c0_i32_1 = arith.constant 0 : i32
    return %c0_i32, %c0_i32_0 : i32, i32
  }
  func.func @transform_4(%arg0: i32, %arg1: i32, %arg2: i32, %arg3: memref<1xi32, #tpu.memory_space<smem>>, %arg4: memref<1x1xi32, #tpu.memory_space<smem>>, %arg5: memref<3x1x1xi32, #tpu.memory_space<smem>>, %arg6: memref<3x1xi32, #tpu.memory_space<smem>>) -> (i32, i32) {
    %0 = arith.index_cast %arg0 : i32 to index
    %1 = arith.index_cast %arg1 : i32 to index
    %2 = memref.load %arg6[%0, %1] : memref<3x1xi32, #tpu.memory_space<smem>>
    %c0_i32 = arith.constant 0 : i32
    %c0_i32_0 = arith.constant 0 : i32
    return %c0_i32, %2 : i32, i32
  }
  func.func @transform_5(%arg0: i32, %arg1: i32, %arg2: i32, %arg3: memref<1xi32, #tpu.memory_space<smem>>, %arg4: memref<1x1xi32, #tpu.memory_space<smem>>, %arg5: memref<3x1x1xi32, #tpu.memory_space<smem>>, %arg6: memref<3x1xi32, #tpu.memory_space<smem>>) -> (i32, i32) {
    %c0_i32 = arith.constant 0 : i32
    %c0_i32_0 = arith.constant 0 : i32
    %c0_i32_1 = arith.constant 0 : i32
    return %c0_i32, %c0_i32_0 : i32, i32
  }
}

</mosaic_0001>

<bundles_post_ra>
// kernel: tpu_custom_call.1
= control target key start
LH: loop header
LB: loop body
LE: loop exit
PB: predicated region body
PF: predicated region fallthrough
CT: control target
= control target key end

     0   :  { %s3305_s16 = smov [#allocation7]   ;;  %s3306_s20 = smov [#allocation8]   ;;  %s3700_s0 = inlined_call_operand.<no memory space> [shape: s32[1], index: 0, kind: input, shape index: {}]   ;;  %s3701_s1 = inlined_call_operand.<no memory space> [shape: s32[1,1], index: 1, kind: input, shape index: {}]   ;;  %s3702_s2 = inlined_call_operand.vmem [shape: s32[3,1,1], index: 2, kind: input, shape index: {}]   ;;  %s3703_s4 = inlined_call_operand.hbm [shape: bf16[256,128], index: 4, kind: input, shape index: {}]   ;;  %s3704_s5 = inlined_call_operand.hbm [shape: bf16[256,256], index: 5, kind: input, shape index: {}]   ;;  %s3705_s6 = inlined_call_operand.hbm [shape: bf16[128,128], index: 6, kind: input, shape index: {}]   ;;  %s3706_s7 = inlined_call_operand.vmem [shape: f32[1,128], index: 7, kind: input, shape index: {}]   ;;  %s3707_s8 = inlined_call_operand.vmem [shape: bf16[8,256], index: 8, kind: input, shape index: {}]   ;;  %s3708_s9 = inlined_call_operand.hbm [shape: f32[8,128], index: 9, kind: output, shape index: {}]   ;;  %s3709_s3 = inlined_call_operand.vmem [shape: s32[3,1], index: 3, kind: input, shape index: {}]  }
   0x1   :  { %3715 = sst [smem:[#allocation25_spill]] %s3704_s5  ;;  %s17_s13 = sshll.u32 %s3702_s2, 4  ;;  %s18_s13 = int_to_ptr.vmem [resolvable:$true] %s17_s13 }
   0x2   :  { %3716 = sst [smem:[#allocation26_spill]] %s3705_s6  ;;  %s22_s19 = sshll.u32 %s3709_s3, 4  ;;  %s23_s19 = int_to_ptr.vmem [resolvable:$true] %s22_s19 }
   0x3   :  { %14 = sst [smem:[#allocation5]] %s3700_s0 }
   0x4   :  { %15 = sst [smem:[#allocation6]] %s3701_s1 }
   0x5   :  { %20 = dma.vmem_to_smem %s18_s13, 48, %s3305_s16, [#allocation4] }
   0x6   :  { %25 = dma.vmem_to_smem %s23_s19, 64, %s3306_s20, [#allocation4] }
   0x7   :  { %3255 = dma.done.wait [#allocation4], 112 }
   0x8   :  { %3256 = vsyncadd [#allocation4], 4294967184 }
   0x9   :  { %28 = sfence }
   0xa   :  { %29 = vsyncpa [#allocation10], 0 }
   0xb   :  { %31 = vsyncpa [#allocation10 + $0x1], 0 }
   0xc   :  { %32 = vsyncpa [#allocation13], 0 }
   0xd   :  { %33 = vsyncpa [#allocation11], 0  ;;  %s3378_s0 = smov 0   ;;  %s3380_s1 = smov 0  }
   0xe   :  { %s3382_s2 = smov 0   ;;  %s3384_s21 = smov 0  }
   0xf   :  { %s3386_s22 = smov 0   ;;  %s3388_s3 = smov 0  }
  0x10   :  { %s3390_s23 = smov 0   ;;  %s3392_s24 = smov 0  }
  0x11 LB: > { %3717 = sst [smem:[#allocation23_spill]] %s3299_s23  ;;  %s3710_s25 = sadd.s32 4294967295, %s3303_s24   ;;  %s3303_s24 = sphi %s3392_s24, %s39_s24   ;;  %s3299_s23 = sphi %s3390_s23, %s3733_s23   ;;  %s3295_s3 = sphi %s3388_s3, %s3732_s3   ;;  %s3291_s22 = sphi %s3386_s22, %s3737_s22   ;;  %s3287_s21 = sphi %s3384_s21, %s3736_s21   ;;  %s3283_s2 = sphi %s3382_s2, %s3735_s2   ;;  %s3279_s1 = sphi %s3380_s1, %s3681_s1   ;;  %s3275_s0 = sphi %s3378_s0, %s3734_s0  }
  0x12   : > { %s113_s26 = sld [smem:[#allocation6]]  ;;  %p3419_p0 = scmp.eq.s32.totalorder %s3710_s25, 0 }
  0x13   : > { %p140_p1 = scmp.ne.s32.totalorder %s3279_s1, %s3275_s0  ;;  %p2254_p2 = scmp.ge.s32.totalorder %s3303_s24, 1 }
  0x14   : > { %p256_p3 = scmp.lt.s32.totalorder %s3303_s24, 4  ;;  %s3307_s29 = smov [#allocation12]  }
  0x15   : > { %p3428_p4 = por %p140_p1, %p3419_p0  ;;  %s283_s30 = sshll.u32 %s3307_s29, 4  ;;  %s284_s30 = int_to_ptr.vmem [resolvable:$true] %s283_s30 }
  0x16   : > { %p3432_p5 = pnand %p2254_p2, %p256_p3  ;;  %s3721_s5 = sld [smem:[#allocation25_spill]] }
  0x18   : > { %s2700_s11 = sshll.u32 %s113_s26, 3  ;;  %p2975_p6 = pneg %p3432_p5 }
  0x1a   : > { %p3446_p7 = pnand %p2975_p6, %p3428_p4 }
  0x1c   : > { %s280_s14 = scalar_lea.hbm %s3721_s5, %s2700_s11  ;;  %p3105_p9 = pneg %p3446_p7 }
  0x1d   : > { %s281_s15 = sshll.u32 %s280_s14, 4  ;;  %s3108_s0 = scalar_lea.hbm %s3721_s5, 256  ;;  %s282_s15 = int_to_ptr.hbm [resolvable:$true] %s281_s15 }
  0x1e   : > { %s3101_s17 = sshra.s32 %s282_s15, 4  ;;  %s3102_s17 = int_to_ptr.hbm [resolvable:$true] %s3101_s17 }
  0x1f   : > { %s3103_s18 = scalar_lea.hbm %s3102_s17, 256  ;;  %p3109_p12 = scmp.lt.s32.totalorder %s3102_s17, %s3721_s5 }
  0x20   : > { %p3104_p8 = scmp.ne.s32.totalorder %s3102_s17, %s3103_s18  ;;  %p3110_p13 = scmp.lt.s32.totalorder %s3108_s0, %s3103_s18 }
  0x22   : > { %p3106_p10 = pnand %p3105_p9, %p3104_p8  ;;  %p3111_p1 = por %p3110_p13, %p3109_p12 }
  0x24   : > { %p3107_p11 = pneg %p3106_p10 }
  0x26   : > { %p3112_p2 = pnand %p3111_p1, %p3107_p11 }
  0x28   : > { %3115 = shalt.err (!%p3112_p2)
}
  0x29   : > { %s3308_s11 = smov 128   ;;  %s3309_s12 = smov 8  }
  0x2a   : > { %2978 = dma.hbm_to_vmem [thread:$0]  (!%p3446_p7), %s282_s15, 4096, %s284_s30, [#allocation13], %s3308_s11, %s3308_s11, %s3309_s12  }
  0x2b   : > { %p2979_p3 = pnand %p2975_p6, %p3419_p0  ;;  %s3723_s6 = sld [smem:[#allocation26_spill]] }
  0x2c   : > { %s3310_s18 = smov [#allocation14]   ;;  %s3711_s20 = smov 64  }
  0x2d   : > { %s297_s19 = sshll.u32 %s3310_s18, 4  ;;  %s3712_s30 = smov 4   ;;  %s298_s19 = int_to_ptr.vmem [resolvable:$true] %s297_s19 }
  0x2e   : > { %s58_s15 = sadd.s32 1, %s3299_s23  ;;  %s2250_s16 = sshll.u32 %s3299_s23, 7 }
  0x2f   : > { %p60_p6 = scmp.ge.s32.totalorder %s58_s15, 3  ;;  %s70_s0 = sld [smem:[#allocation7 + %s2250_s16]] }
  0x30   : > { %p90_p7 = scmp.ne.s32.totalorder %s3291_s22, %s3287_s21  ;;  %p91_p8 = scmp.eq.s32.totalorder %s3303_s24, 0 }
  0x31   : > { %s295_s17 = sshll.u32 %s3723_s6, 4  ;;  %s3739_s15 = smov (%p60_p6, %s58_s15), 0  ;;  %s296_s17 = int_to_ptr.hbm [resolvable:$true] %s295_s17 }
  0x32   : > { %2981 = dma.hbm_to_vmem [thread:$0]  (!%p2979_p3), %s296_s17, 1024, %s298_s19, [#allocation13], %s3711_s20, %s3711_s20, %s3712_s30  }
  0x33   : > { %3724 = sst [smem:[#allocation24_spill]] %s3739_s15  ;;  %p96_p9 = scmp.ne.s32.totalorder %s3287_s21, %s3283_s2 }
  0x34   : > { %s2251_s26 = sshll.u32 %s3739_s15, 7  ;;  %p92_p10 = por %p91_p8, %p90_p7 }
  0x35   : > { %s79_s29 = sld [smem:[#allocation7 + %s2251_s26]]  ;;  %p3483_p11 = por %p3419_p0, %p96_p9 }
  0x36   : > { %s83_s12 = sadd.s32 1, %s3291_s22  ;;  %p2989_p12 = scmp.lt.s32.totalorder %s3303_s24, 3 }
  0x37   : > { %s314_s13 = sand.u32 1, %s3291_s22   ;;  %s3741_s16 = smov (!%p92_p10, %s2250_s16), 0 }
  0x38   : > { %s2964_s14 = scalar_select %p92_p10, [#allocation7], [#allocation16] }
  0x39   : > { %s2259_s18 = sshll.u32 %s314_s13, 7  ;;  %p3490_p1 = pnand %p2989_p12, %p92_p10 }
  0x3a   : > { %s3743_s14 = smov (!%p2989_p12, %s2964_s14), [#allocation17]  ;;  %s3745_s16 = smov (!%p2989_p12, %s3741_s16), 0 }
  0x3b   : > { %s80_s17 = ssub.s32 %s70_s0, %s79_s29  ;;  %s327_s26 = sld [smem:[%s3743_s14 + %s3745_s16]] }
  0x3c   : > { %p81_p13 = scmp.eq.s32.totalorder %s80_s17, 0  ;;  %s318_s25 = scalar_lea.vmem [#allocation9], %s2259_s18 }
  0x3d   : > { %s335_s20 = sshll.u32 %s318_s25, 4  ;;  %s315_s29 = scalar_lea.sflag [#allocation10], %s314_s13  ;;  %s336_s20 = int_to_ptr.vmem [resolvable:$true] %s335_s20 }
  0x3e   : > { %s3495_s2 = scalar_select %p81_p13, %s3291_s22, %s83_s12  }
  0x3f   : > { %p3165_p3 = pneg %p3490_p1  ;;  %s3168_s25 = scalar_lea.hbm %s3703_s4, 128 }
  0x41   : > { %s2701_s30 = sshll.u32 %s327_s26, 7 }
  0x42   : > { %s332_s15 = scalar_lea.hbm %s3703_s4, %s2701_s30 }
  0x43   : > { %s333_s0 = sshll.u32 %s332_s15, 4  ;;  %s334_s0 = int_to_ptr.hbm [resolvable:$true] %s333_s0 }
  0x44   : > { %s3161_s17 = sshra.s32 %s334_s0, 4  ;;  %s3162_s17 = int_to_ptr.hbm [resolvable:$true] %s3161_s17 }
  0x45   : > { %s3163_s23 = scalar_lea.hbm %s3162_s17, 128  ;;  %p3169_p8 = scmp.lt.s32.totalorder %s3162_s17, %s3703_s4 }
  0x46   : > { %p3164_p2 = scmp.ne.s32.totalorder %s3162_s17, %s3163_s23  ;;  %p3170_p9 = scmp.lt.s32.totalorder %s3168_s25, %s3163_s23 }
  0x48   : > { %p3166_p6 = pnand %p3165_p3, %p3164_p2  ;;  %p3171_p10 = por %p3170_p9, %p3169_p8 }
  0x4a   : > { %p3167_p7 = pneg %p3166_p6 }
  0x4c   : > { %p3172_p12 = pnand %p3171_p10, %p3167_p7 }
  0x4e   : > { %3175 = shalt.err (!%p3172_p12)
}
  0x4f   : > { %s3727_s5 = smov 4   ;;  %s3728_s6 = smov 64  }
  0x50   : > { %2987 = dma.hbm_to_vmem [thread:$0]  (!%p3490_p1), %s334_s0, 2048, %s336_s20, %s315_s29, %s3728_s6, %s3728_s6, %s3727_s5  }
  0x51   : > { %372 = sbr.rel (%p3432_p5) target bundleno = 1182 (0x49e), region = 40  ;;  %s374_s30 = sand.u32 (!%p3432_p5), 1, %s3287_s21  }
  0x52   : > { %s2264_s15 = sshll.u32 (!%p3432_p5), %s374_s30, 7  ;;  %s375_s13 = scalar_lea.sflag (!%p3432_p5), [#allocation10], %s374_s30 }
  0x53   : > { %s3516_s26 = scalar_lea.vmem (!%p3432_p5), [#allocation9], %s2264_s15 }
  0x56   : > { %3258 = dma.done.wait (%p3483_p11), %s375_s13, 2048  }
  0x57   : > { %3260 = vsyncadd (%p3483_p11), %s375_s13, 4294965248 }
  0x58   : > { %3262 = dma.done.wait (%p3428_p4), [#allocation13], 4096  }
  0x59   : > { %3264 = vsyncadd (%p3428_p4), [#allocation13], 4294963200 }
  0x5a   : > { %3266 = dma.done.wait (%p3419_p0), [#allocation13], 1024  }
  0x5b   : > { %3268 = vsyncadd (%p3419_p0), [#allocation13], 4294966272  ;;  %s2266_s23 = sshll.u32 %s3295_s3, 7  ;;  %p475_p5 = scmp.eq.s32.totalorder %s3295_s3, 0 }
  0x5c   : > { %s451_s10 = sld [smem:[#allocation8 + %s2266_s23]]  ;;  %v3313_v0 = vmov (%p475_p5), 0.0  }
  0x5d   : > { %s3532_s20 = sld [smem:[#allocation5]]  ;;  %484 = vst [vmem:[#allocation15] sm:$0xff] (%p475_p5), %v3313_v0 }
  0x5e   : > { %s3534_s11 = sld [smem:[#allocation6]] }
  0x62   : > { %s2267_s19 = sshll.u32 %s451_s10, 1 }
  0x63   : > { %p453_p11 = scmp.lt.s32.totalorder %s2267_s19, 1  ;;  %483 = sbr.rel (!%p475_p5) target bundleno = 104 (0x68), region = 56 }
  0x65   : > { %s3747_s19 = smov (!%p453_p11, %s2267_s19), 1 }
  0x66   : > { %s2268_s28 = sshll.u32 %s3747_s19, 2 }
  0x67   : > { %s3539_s17 = scalar_lea.vmem %s3707_s8, %s2268_s28 }
  0x68 PF: > { %p2271_p0 = scmp.gt.s32.totalorder %s3532_s20, 0  ;;  %v3314_v1 = vmov 0.0  }
  0x69   : > { %488 = vst [vmem:[#allocation3 + $0xb0] sm:$0xff] %v3314_v1 }
  0x6a   : > { %489 = vst [vmem:[#allocation3] sm:$0xff] %v3314_v1  ;;  %p3548_p4 = pnand %p2271_p0, %p475_p5 }
  0x6b   : > { %490 = vst [vmem:[#allocation3 + $0xd8] sm:$0xff] %v3314_v1 }
  0x6c   : > { %491 = vst [vmem:[#allocation3 + $0x18] sm:$0xff] %v3314_v1 }
  0x6d   : > { %492 = vst [vmem:[#allocation3 + $0x50] sm:$0xff] %v3314_v1 }
  0x6e   : > { %493 = vst [vmem:[#allocation3 + $0x68] sm:$0xff] %v3314_v1 }
  0x6f   : > { %494 = vst [vmem:[#allocation3 + $0x30] sm:$0xff] %v3314_v1 }
  0x70   : > { %495 = vst [vmem:[#allocation3 + $0x48] sm:$0xff] %v3314_v1 }
  0x71   : > { %496 = vst [vmem:[#allocation3 + $0x80] sm:$0xff] %v3314_v1 }
  0x72   : > { %497 = vst [vmem:[#allocation3 + $0x88] sm:$0xff] %v3314_v1 }
  0x73   : > { %498 = vst [vmem:[#allocation3 + $0xe8] sm:$0xff] %v3314_v1 }
  0x74   : > { %499 = vst [vmem:[#allocation3 + $0xb8] sm:$0xff] %v3314_v1 }
  0x75   : > { %500 = vst [vmem:[#allocation3 + $0x60] sm:$0xff] %v3314_v1 }
  0x76   : > { %501 = vst [vmem:[#allocation3 + $0xf0] sm:$0xff] %v3314_v1 }
  0x77   : > { %502 = vst [vmem:[#allocation3 + $0x8] sm:$0xff] %v3314_v1 }
  0x78   : > { %503 = vst [vmem:[#allocation3 + $0x78] sm:$0xff] %v3314_v1 }
  0x79   : > { %504 = vst [vmem:[#allocation3 + $0x38] sm:$0xff] %v3314_v1 }
  0x7a   : > { %505 = vst [vmem:[#allocation3 + $0x58] sm:$0xff] %v3314_v1 }
  0x7b   : > { %506 = vst [vmem:[#allocation3 + $0x40] sm:$0xff] %v3314_v1 }
  0x7c   : > { %507 = vst [vmem:[#allocation3 + $0xc8] sm:$0xff] %v3314_v1 }
  0x7d   : > { %508 = vst [vmem:[#allocation3 + $0xe0] sm:$0xff] %v3314_v1 }
  0x7e   : > { %509 = vst [vmem:[#allocation3 + $0x90] sm:$0xff] %v3314_v1 }
  0x7f   : > { %510 = vst [vmem:[#allocation3 + $0x70] sm:$0xff] %v3314_v1 }
  0x80   : > { %511 = vst [vmem:[#allocation3 + $0xc0] sm:$0xff] %v3314_v1 }
  0x81   : > { %512 = vst [vmem:[#allocation3 + $0xa8] sm:$0xff] %v3314_v1 }
  0x82   : > { %513 = vst [vmem:[#allocation3 + $0xd0] sm:$0xff] %v3314_v1 }
  0x83   : > { %514 = vst [vmem:[#allocation3 + $0x10] sm:$0xff] %v3314_v1 }
  0x84   : > { %515 = vst [vmem:[#allocation3 + $0x28] sm:$0xff] %v3314_v1  ;;  %524 = sbr.rel (%p3548_p4) target bundleno = 427 (0x1ab), region = 64 }
  0x85   : > { %516 = vst [vmem:[#allocation3 + $0xa0] sm:$0xff] %v3314_v1 }
  0x86   : > { %517 = vst [vmem:[#allocation3 + $0xf8] sm:$0xff] %v3314_v1 }
  0x87   : > { %518 = vst [vmem:[#allocation3 + $0x20] sm:$0xff] %v3314_v1 }
  0x88   : > { %519 = vst [vmem:[#allocation3 + $0x98] sm:$0xff] %v3314_v1 }
  0x89   : > { %v2743_v2 = vld [vmem:[%s3516_s26 + $0x38] sm:$0xff]  ;;  %v2742_v4 = vld [vmem:[%s3516_s26 + $0x30] sm:$0xff]  ;;  %v2741_v6 = vld [vmem:[%s3516_s26 + $0x28] sm:$0xff] }
  0x8a   : > { %v2751_v3 = vld [vmem:[%s3516_s26 + $0x78] sm:$0xff]  ;;  %877 = vmatpush.bf16.msra.mxu0 %v2743_v2  ;;  %2905 = vmatpush.bf16.msra.mxu2 %v2743_v2  ;;  %v2750_v5 = vld [vmem:[%s3516_s26 + $0x70] sm:$0xff]  ;;  %v2749_v7 = vld [vmem:[%s3516_s26 + $0x68] sm:$0xff] }
  0x8b   : > { %966 = vmatpush.bf16.msra.mxu1 %v2751_v3  ;;  %2913 = vmatpush.bf16.msra.mxu3 %v2751_v3  ;;  %v2740_v8 = vld [vmem:[%s3516_s26 + $0x20] sm:$0xff]  ;;  %v2739_v10 = vld [vmem:[%s3516_s26 + $0x18] sm:$0xff]  ;;  %v2738_v12 = vld [vmem:[%s3516_s26 + $0x10] sm:$0xff] }
  0x8c   : > { %v2748_v9 = vld [vmem:[%s3516_s26 + $0x60] sm:$0xff]  ;;  %v2747_v11 = vld [vmem:[%s3516_s26 + $0x58] sm:$0xff]  ;;  %v2746_v13 = vld [vmem:[%s3516_s26 + $0x50] sm:$0xff] }
  0x8d   : > { %v2737_v14 = vld [vmem:[%s3516_s26 + $0x8] sm:$0xff]  ;;  %v2736_v16 = vld [vmem:[%s3516_s26] sm:$0xff]  ;;  %v2282_v30 = vld [vmem:[#allocation12 + $0x10] sm:$0xf] }
  0x8e   : > { %878 = vmatpush.bf16.msra.mxu0 %v2742_v4  ;;  %2906 = vmatpush.bf16.msra.mxu2 %v2742_v4  ;;  %v2745_v15 = vld [vmem:[%s3516_s26 + $0x48] sm:$0xff]  ;;  %v2744_v17 = vld [vmem:[%s3516_s26 + $0x40] sm:$0xff]  ;;  %v2707_v31 = vld [vmem:[#allocation12 + $0x14] sm:$0xf0] }
  0x8f   : > { %967 = vmatpush.bf16.msra.mxu1 %v2750_v5  ;;  %2914 = vmatpush.bf16.msra.mxu3 %v2750_v5  ;;  %v2274_v18 = vld [vmem:[#allocation12] sm:$0xf]  ;;  %v2705_v19 = vld [vmem:[#allocation12 + $0x4] sm:$0xf0]  ;;  %v2704_v22 = vld [vmem:[#allocation12 + $0x4] sm:$0xf]  ;;  %v2283_v38 = vor.u32 %v2707_v31, %v2282_v30 }
  0x90   : > { %v2338_v20 = vld [vmem:[#allocation12 + $0x80] sm:$0xf]  ;;  %v2721_v21 = vld [vmem:[#allocation12 + $0x84] sm:$0xf0]  ;;  %v2276_v23 = vld [vmem:[#allocation12 + $0x8] sm:$0xf0]  ;;  %v2275_v26 = vor.u32 %v2705_v19, %v2274_v18 }
  0x91   : > { %v2720_v24 = vld [vmem:[#allocation12 + $0x84] sm:$0xf]  ;;  %v2340_v25 = vld [vmem:[#allocation12 + $0x88] sm:$0xf0]  ;;  %v2339_v27 = vor.u32 %v2721_v21, %v2338_v20  ;;  %v2279_v28 = vor.u32 %v2704_v22, %v2276_v23  ;;  %v2346_v32 = vld [vmem:[#allocation12 + $0x90] sm:$0xf] }
  0x92   : > { %879 = vmatpush.bf16.msra.mxu0 %v2741_v6  ;;  %2907 = vmatpush.bf16.msra.mxu2 %v2741_v6  ;;  %v2343_v29 = vor.u32 %v2720_v24, %v2340_v25  ;;  %v2723_v33 = vld [vmem:[#allocation12 + $0x94] sm:$0xf0]  ;;  %v2706_v34 = vld [vmem:[#allocation12 + $0x14] sm:$0xf]  ;;  %v2284_v35 = vld [vmem:[#allocation12 + $0x18] sm:$0xf0] }
  0x93   : > { %968 = vmatpush.bf16.msra.mxu1 %v2749_v7  ;;  %2915 = vmatpush.bf16.msra.mxu3 %v2749_v7  ;;  %v2722_v36 = vld [vmem:[#allocation12 + $0x94] sm:$0xf]  ;;  %v2348_v37 = vld [vmem:[#allocation12 + $0x98] sm:$0xf0]  ;;  %v2347_v39 = vor.u32 %v2723_v33, %v2346_v32  ;;  %v2287_v40 = vor.u32 %v2706_v34, %v2284_v35  ;;  %v2290_v42 = vld [vmem:[#allocation12 + $0x20] sm:$0xf] }
  0x94   : > { %v2351_v41 = vor.u32 %v2722_v36, %v2348_v37  ;;  %v2709_v43 = vld [vmem:[#allocation12 + $0x24] sm:$0xf0]  ;;  %v2354_v44 = vld [vmem:[#allocation12 + $0xa0] sm:$0xf]  ;;  %v2708_v46 = vld [vmem:[#allocation12 + $0x24] sm:$0xf] }
  0x95   : > { %v2725_v45 = vld [vmem:[#allocation12 + $0xa4] sm:$0xf0]  ;;  %v2292_v47 = vld [vmem:[#allocation12 + $0x28] sm:$0xf0]  ;;  %v2724_v48 = vld [vmem:[#allocation12 + $0xa4] sm:$0xf]  ;;  %v2291_v50 = vor.u32 %v2709_v43, %v2290_v42 }
  0x96   : > { %880 = vmatpush.bf16.msra.mxu0 %v2740_v8  ;;  %2908 = vmatpush.bf16.msra.mxu2 %v2740_v8  ;;  %v2356_v49 = vld [vmem:[#allocation12 + $0xa8] sm:$0xf0]  ;;  %v2355_v51 = vor.u32 %v2725_v45, %v2354_v44  ;;  %v2295_v52 = vor.u32 %v2708_v46, %v2292_v47  ;;  %v2298_v54 = vld [vmem:[#allocation12 + $0x30] sm:$0xf]  ;;  %v2711_v55 = vld [vmem:[#allocation12 + $0x34] sm:$0xf0] }
  0x97   : > { %969 = vmatpush.bf16.msra.mxu1 %v2748_v9  ;;  %2916 = vmatpush.bf16.msra.mxu3 %v2748_v9  ;;  %v2359_v53 = vor.u32 %v2724_v48, %v2356_v49  ;;  %v2362_v56 = vld [vmem:[#allocation12 + $0xb0] sm:$0xf]  ;;  %v2727_v57 = vld [vmem:[#allocation12 + $0xb4] sm:$0xf0]  ;;  %v2710_v58 = vld [vmem:[#allocation12 + $0x34] sm:$0xf]  ;;  %v2299_v62 = vor.u32 %v2711_v55, %v2298_v54 }
  0x98   : > { %v2300_v59 = vld [vmem:[#allocation12 + $0x38] sm:$0xf0]  ;;  %v2726_v60 = vld [vmem:[#allocation12 + $0xb4] sm:$0xf]  ;;  %v2363_v63 = vor.u32 %v2727_v57, %v2362_v56  ;;  %v2306_v2 = vld [vmem:[#allocation12 + $0x40] sm:$0xf] }
  0x99   : > { %v2364_v61 = vld [vmem:[#allocation12 + $0xb8] sm:$0xf0]  ;;  %v2303_v0 = vor.u32 %v2710_v58, %v2300_v59  ;;  %v2713_v3 = vld [vmem:[#allocation12 + $0x44] sm:$0xf0]  ;;  %v2370_v4 = vld [vmem:[#allocation12 + $0xc0] sm:$0xf] }
  0x9a   : > { %881 = vmatpush.bf16.msra.mxu0 %v2739_v10  ;;  %2909 = vmatpush.bf16.msra.mxu2 %v2739_v10  ;;  %v2367_v1 = vor.u32 %v2726_v60, %v2364_v61  ;;  %v2729_v5 = vld [vmem:[#allocation12 + $0xc4] sm:$0xf0]  ;;  %v2712_v6 = vld [vmem:[#allocation12 + $0x44] sm:$0xf]  ;;  %v2308_v7 = vld [vmem:[#allocation12 + $0x48] sm:$0xf0]  ;;  %v2307_v10 = vor.u32 %v2713_v3, %v2306_v2 }
  0x9b   : > { %970 = vmatpush.bf16.msra.mxu1 %v2747_v11  ;;  %2917 = vmatpush.bf16.msra.mxu3 %v2747_v11  ;;  %v2728_v8 = vld [vmem:[#allocation12 + $0xc4] sm:$0xf]  ;;  %v2372_v9 = vld [vmem:[#allocation12 + $0xc8] sm:$0xf0]  ;;  %v2371_v11 = vor.u32 %v2729_v5, %v2370_v4  ;;  %v2714_v18 = vld [vmem:[#allocation12 + $0x54] sm:$0xf] }
  0x9c   : > { %v2316_v19 = vld [vmem:[#allocation12 + $0x58] sm:$0xf0]  ;;  %v2730_v20 = vld [vmem:[#allocation12 + $0xd4] sm:$0xf]  ;;  %v2716_v30 = vld [vmem:[#allocation12 + $0x64] sm:$0xf] }
  0x9d   : > { %v2380_v21 = vld [vmem:[#allocation12 + $0xd8] sm:$0xf0]  ;;  %v2319_v24 = vor.u32 %v2714_v18, %v2316_v19  ;;  %v2324_v31 = vld [vmem:[#allocation12 + $0x68] sm:$0xf0]  ;;  %v2732_v32 = vld [vmem:[#allocation12 + $0xe4] sm:$0xf] }
  0x9e   : > { %882 = vmatpush.bf16.msra.mxu0 %v2738_v12  ;;  %2910 = vmatpush.bf16.msra.mxu2 %v2738_v12  ;;  %v2311_v12 = vor.u32 %v2712_v6, %v2308_v7  ;;  %v2383_v25 = vor.u32 %v2730_v20, %v2380_v21  ;;  %v2388_v33 = vld [vmem:[#allocation12 + $0xe8] sm:$0xf0]  ;;  %v2327_v36 = vor.u32 %v2716_v30, %v2324_v31  ;;  %v2718_v42 = vld [vmem:[#allocation12 + $0x74] sm:$0xf]  ;;  %v2332_v43 = vld [vmem:[#allocation12 + $0x78] sm:$0xf0] }
  0x9f   : > { %971 = vmatpush.bf16.msra.mxu1 %v2746_v13  ;;  %2918 = vmatpush.bf16.msra.mxu3 %v2746_v13  ;;  %v2375_v13 = vor.u32 %v2728_v8, %v2372_v9  ;;  %v2391_v37 = vor.u32 %v2732_v32, %v2388_v33  ;;  %v2734_v44 = vld [vmem:[#allocation12 + $0xf4] sm:$0xf]  ;;  %v2396_v45 = vld [vmem:[#allocation12 + $0xf8] sm:$0xf0]  ;;  %v2335_v48 = vor.u32 %v2718_v42, %v2332_v43  ;;  %v526_v60 = vld [vmem:[#allocation3] sm:$0xff] }
  0xa0   : > { %v2399_v49 = vor.u32 %v2734_v44, %v2396_v45  ;;  %v541_v56 = vld [vmem:[#allocation3 + $0x38] sm:$0xff]  ;;  %v545_v32 = vld [vmem:[#allocation3 + $0xe0] sm:$0xff]  ;;  %v546_v42 = vld [vmem:[#allocation3 + $0x90] sm:$0xff] }
  0xa1   : > { %v542_v2 = vld [vmem:[#allocation3 + $0x58] sm:$0xff] }
  0xa2   : > { %883 = vmatpush.bf16.msra.mxu0 %v2737_v14  ;;  %2911 = vmatpush.bf16.msra.mxu2 %v2737_v14  ;;  %v2314_v14 = vld [vmem:[#allocation12 + $0x50] sm:$0xf]  ;;  %v527_v6 = vld [vmem:[#allocation3 + $0xd8] sm:$0xff] }
  0xa3   : > { %972 = vmatpush.bf16.msra.mxu1 %v2745_v15  ;;  %2919 = vmatpush.bf16.msra.mxu3 %v2745_v15  ;;  %v2715_v15 = vld [vmem:[#allocation12 + $0x54] sm:$0xf0] }
  0xa4   : > { %v2315_v22 = vor.u32 %v2715_v15, %v2314_v14 }
  0xa6   : > { %884 = vmatpush.bf16.msra.mxu0 %v2736_v16  ;;  %2912 = vmatpush.bf16.msra.mxu2 %v2736_v16  ;;  %v2378_v16 = vld [vmem:[#allocation12 + $0xd0] sm:$0xf] }
  0xa7   : > { %973 = vmatpush.bf16.msra.mxu1 %v2744_v17  ;;  %2920 = vmatpush.bf16.msra.mxu3 %v2744_v17  ;;  %v2731_v17 = vld [vmem:[#allocation12 + $0xd4] sm:$0xf0] }
  0xa8   : > { %v2379_v23 = vor.u32 %v2731_v17, %v2378_v16  ;;  %v528_v16 = vld [vmem:[#allocation3 + $0x18] sm:$0xff] }
  0xa9   : > { %885 = vmatmul.bf16.vlgmr.msra.gmra.mxu0 %v2275_v26  ;;  %925 = vmatmul.bf16.vlgmr.msra.gmra.mxu2 %v2339_v27  ;;  %v2322_v26 = vld [vmem:[#allocation12 + $0x60] sm:$0xf]  ;;  %v2717_v27 = vld [vmem:[#allocation12 + $0x64] sm:$0xf0] }
  0xaa   : > { %974 = vmatmul.bf16.vlgmr.msra.gmra.mxu1 %v2279_v28  ;;  %1014 = vmatmul.bf16.vlgmr.msra.gmra.mxu3 %v2343_v29  ;;  %v2386_v28 = vld [vmem:[#allocation12 + $0xe0] sm:$0xf]  ;;  %v2733_v29 = vld [vmem:[#allocation12 + $0xe4] sm:$0xf0]  ;;  %v2323_v34 = vor.u32 %v2717_v27, %v2322_v26  ;;  %v529_v26 = vld [vmem:[#allocation3 + $0x50] sm:$0xff] }
  0xab   : > { %v2387_v35 = vor.u32 %v2733_v29, %v2386_v28 }
  0xb9   : > { %890 = vmatmul.bf16.gmra.mxu0 %v2283_v38  ;;  %930 = vmatmul.bf16.gmra.mxu2 %v2347_v39  ;;  %v2330_v38 = vld [vmem:[#allocation12 + $0x70] sm:$0xf]  ;;  %v2719_v39 = vld [vmem:[#allocation12 + $0x74] sm:$0xf0] }
  0xba   : > { %979 = vmatmul.bf16.gmra.mxu1 %v2287_v40  ;;  %1019 = vmatmul.bf16.gmra.mxu3 %v2351_v41  ;;  %v2394_v40 = vld [vmem:[#allocation12 + $0xf0] sm:$0xf]  ;;  %v2735_v41 = vld [vmem:[#allocation12 + $0xf4] sm:$0xf0]  ;;  %v2331_v46 = vor.u32 %v2719_v39, %v2330_v38 }
  0xbb   : > { %v2395_v47 = vor.u32 %v2735_v41, %v2394_v40 }
  0xc9   : > { %895 = vmatmul.bf16.gmra.mxu0 %v2291_v50  ;;  %935 = vmatmul.bf16.gmra.mxu2 %v2355_v51  ;;  %v525_v51 = vld [vmem:[#allocation3 + $0xb0] sm:$0xff] }
  0xca   : > { %984 = vmatmul.bf16.gmra.mxu1 %v2295_v52  ;;  %1024 = vmatmul.bf16.gmra.mxu3 %v2359_v53 }
  0xd9   : > { %900 = vmatmul.bf16.gmra.mxu0 %v2299_v62  ;;  %940 = vmatmul.bf16.gmra.mxu2 %v2363_v63 }
  0xda   : > { %989 = vmatmul.bf16.gmra.mxu1 %v2303_v0  ;;  %1029 = vmatmul.bf16.gmra.mxu3 %v2367_v1 }
  0xe9   : > { %905 = vmatmul.bf16.gmra.mxu0 %v2307_v10  ;;  %945 = vmatmul.bf16.gmra.mxu2 %v2371_v11 }
  0xea   : > { %994 = vmatmul.bf16.gmra.mxu1 %v2311_v12  ;;  %1034 = vmatmul.bf16.gmra.mxu3 %v2375_v13  ;;  %v543_v12 = vld [vmem:[#allocation3 + $0x40] sm:$0xff] }
  0xf9   : > { %910 = vmatmul.bf16.gmra.mxu0 %v2315_v22  ;;  %950 = vmatmul.bf16.gmra.mxu2 %v2379_v23  ;;  %v544_v22 = vld [vmem:[#allocation3 + $0xc8] sm:$0xff] }
  0xfa   : > { %999 = vmatmul.bf16.gmra.mxu1 %v2319_v24  ;;  %1039 = vmatmul.bf16.gmra.mxu3 %v2383_v25 }
 0x109   : > { %915 = vmatmul.bf16.gmra.mxu0 %v2323_v34  ;;  %955 = vmatmul.bf16.gmra.mxu2 %v2387_v35 }
 0x10a   : > { %1004 = vmatmul.bf16.gmra.mxu1 %v2327_v36  ;;  %1044 = vmatmul.bf16.gmra.mxu3 %v2391_v37  ;;  %v530_v36 = vld [vmem:[#allocation3 + $0x68] sm:$0xff] }
 0x119   : > { %920 = vmatmul.bf16.gmra.mxu0 %v2331_v46  ;;  %960 = vmatmul.bf16.gmra.mxu2 %v2395_v47  ;;  %v531_v46 = vld [vmem:[#allocation3 + $0x30] sm:$0xff] }
 0x11a   : > { %1009 = vmatmul.bf16.gmra.mxu1 %v2335_v48  ;;  %1049 = vmatmul.bf16.gmra.mxu3 %v2399_v49 }
 0x126   : > { %v886_v50 = vpop.f32.mrf.mxu0 }
 0x127   : > { %v975_v52 = vpop.f32.mrf.mxu1 }
 0x128   : > { %v976_v53 = vadd.f32 %v975_v52, %v886_v50  ;;  %v547_v52 = vld [vmem:[#allocation3 + $0x70] sm:$0xff] }
 0x12a   : > { %v1055_v54 = vadd.f32 %v976_v53, %v525_v51 }
 0x12c   : > { %1087 = vst [vmem:[#allocation3 + $0xb0] sm:$0xff] %v1055_v54  ;;  %v926_v55 = vpop.f32.mrf.mxu2 }
 0x12d   : > { %v1015_v57 = vpop.f32.mrf.mxu3 }
 0x12e   : > { %v1016_v58 = vadd.f32 %v1015_v57, %v926_v55  ;;  %v888_v59 = vpop.f32.mrf.mxu0 }
 0x12f   : > { %v977_v61 = vpop.f32.mrf.mxu1 }
 0x130   : > { %v1071_v62 = vadd.f32 %v1016_v58, %v541_v56  ;;  %v978_v63 = vadd.f32 %v977_v61, %v888_v59  ;;  %v532_v56 = vld [vmem:[#allocation3 + $0x48] sm:$0xff] }
 0x132   : > { %1103 = vst [vmem:[#allocation3 + $0x38] sm:$0xff] %v1071_v62  ;;  %v1056_v0 = vadd.f32 %v978_v63, %v526_v60  ;;  %v548_v62 = vld [vmem:[#allocation3 + $0xc0] sm:$0xff] }
 0x134   : > { %1088 = vst [vmem:[#allocation3] sm:$0xff] %v1056_v0  ;;  %v928_v1 = vpop.f32.mrf.mxu2 }
 0x135   : > { %v1017_v3 = vpop.f32.mrf.mxu3 }
 0x136   : > { %v1018_v4 = vadd.f32 %v1017_v3, %v928_v1  ;;  %v891_v5 = vpop.f32.mrf.mxu0 }
 0x137   : > { %v980_v7 = vpop.f32.mrf.mxu1 }
 0x138   : > { %v1072_v8 = vadd.f32 %v1018_v4, %v542_v2  ;;  %v981_v9 = vadd.f32 %v980_v7, %v891_v5  ;;  %v533_v2 = vld [vmem:[#allocation3 + $0x80] sm:$0xff] }
 0x13a   : > { %1104 = vst [vmem:[#allocation3 + $0x58] sm:$0xff] %v1072_v8  ;;  %v1057_v10 = vadd.f32 %v981_v9, %v527_v6  ;;  %v549_v8 = vld [vmem:[#allocation3 + $0xa8] sm:$0xff] }
 0x13c   : > { %1089 = vst [vmem:[#allocation3 + $0xd8] sm:$0xff] %v1057_v10  ;;  %v931_v11 = vpop.f32.mrf.mxu2 }
 0x13d   : > { %v1020_v13 = vpop.f32.mrf.mxu3 }
 0x13e   : > { %v1021_v14 = vadd.f32 %v1020_v13, %v931_v11  ;;  %v893_v15 = vpop.f32.mrf.mxu0 }
 0x13f   : > { %v982_v17 = vpop.f32.mrf.mxu1 }
 0x140   : > { %v1073_v18 = vadd.f32 %v1021_v14, %v543_v12  ;;  %v983_v19 = vadd.f32 %v982_v17, %v893_v15  ;;  %v534_v12 = vld [vmem:[#allocation3 + $0x88] sm:$0xff] }
 0x142   : > { %1105 = vst [vmem:[#allocation3 + $0x40] sm:$0xff] %v1073_v18  ;;  %v1058_v20 = vadd.f32 %v983_v19, %v528_v16  ;;  %v550_v18 = vld [vmem:[#allocation3 + $0xd0] sm:$0xff] }
 0x144   : > { %1090 = vst [vmem:[#allocation3 + $0x18] sm:$0xff] %v1058_v20  ;;  %v933_v21 = vpop.f32.mrf.mxu2 }
 0x145   : > { %v1022_v23 = vpop.f32.mrf.mxu3 }
 0x146   : > { %v1023_v24 = vadd.f32 %v1022_v23, %v933_v21  ;;  %v896_v25 = vpop.f32.mrf.mxu0 }
 0x147   : > { %v985_v27 = vpop.f32.mrf.mxu1 }
 0x148   : > { %v1074_v28 = vadd.f32 %v1023_v24, %v544_v22  ;;  %v986_v29 = vadd.f32 %v985_v27, %v896_v25  ;;  %v535_v22 = vld [vmem:[#allocation3 + $0xe8] sm:$0xff] }
 0x14a   : > { %1106 = vst [vmem:[#allocation3 + $0xc8] sm:$0xff] %v1074_v28  ;;  %v1059_v30 = vadd.f32 %v986_v29, %v529_v26  ;;  %v551_v28 = vld [vmem:[#allocation3 + $0x10] sm:$0xff] }
 0x14c   : > { %1091 = vst [vmem:[#allocation3 + $0x50] sm:$0xff] %v1059_v30  ;;  %v936_v31 = vpop.f32.mrf.mxu2 }
 0x14d   : > { %v1025_v33 = vpop.f32.mrf.mxu3 }
 0x14e   : > { %v1026_v34 = vadd.f32 %v1025_v33, %v936_v31  ;;  %v898_v35 = vpop.f32.mrf.mxu0 }
 0x14f   : > { %v987_v37 = vpop.f32.mrf.mxu1 }
 0x150   : > { %v1075_v38 = vadd.f32 %v1026_v34, %v545_v32  ;;  %v988_v39 = vadd.f32 %v987_v37, %v898_v35  ;;  %v536_v32 = vld [vmem:[#allocation3 + $0xb8] sm:$0xff] }
 0x152   : > { %1107 = vst [vmem:[#allocation3 + $0xe0] sm:$0xff] %v1075_v38  ;;  %v1060_v40 = vadd.f32 %v988_v39, %v530_v36  ;;  %v552_v38 = vld [vmem:[#allocation3 + $0x28] sm:$0xff] }
 0x154   : > { %1092 = vst [vmem:[#allocation3 + $0x68] sm:$0xff] %v1060_v40  ;;  %v938_v41 = vpop.f32.mrf.mxu2 }
 0x155   : > { %v1027_v43 = vpop.f32.mrf.mxu3 }
 0x156   : > { %v1028_v44 = vadd.f32 %v1027_v43, %v938_v41  ;;  %v901_v45 = vpop.f32.mrf.mxu0 }
 0x157   : > { %v990_v47 = vpop.f32.mrf.mxu1 }
 0x158   : > { %v1076_v48 = vadd.f32 %v1028_v44, %v546_v42  ;;  %v991_v49 = vadd.f32 %v990_v47, %v901_v45  ;;  %v537_v42 = vld [vmem:[#allocation3 + $0x60] sm:$0xff] }
 0x15a   : > { %1108 = vst [vmem:[#allocation3 + $0x90] sm:$0xff] %v1076_v48  ;;  %v1061_v50 = vadd.f32 %v991_v49, %v531_v46  ;;  %v553_v48 = vld [vmem:[#allocation3 + $0xa0] sm:$0xff] }
 0x15c   : > { %1093 = vst [vmem:[#allocation3 + $0x30] sm:$0xff] %v1061_v50  ;;  %v941_v51 = vpop.f32.mrf.mxu2 }
 0x15d   : > { %v1030_v53 = vpop.f32.mrf.mxu3 }
 0x15e   : > { %v1031_v54 = vadd.f32 %v1030_v53, %v941_v51  ;;  %v903_v55 = vpop.f32.mrf.mxu0 }
 0x15f   : > { %v992_v57 = vpop.f32.mrf.mxu1 }
 0x160   : > { %v1077_v58 = vadd.f32 %v1031_v54, %v547_v52  ;;  %v993_v59 = vadd.f32 %v992_v57, %v903_v55  ;;  %v538_v52 = vld [vmem:[#allocation3 + $0xf0] sm:$0xff] }
 0x162   : > { %1109 = vst [vmem:[#allocation3 + $0x70] sm:$0xff] %v1077_v58  ;;  %v1062_v60 = vadd.f32 %v993_v59, %v532_v56  ;;  %v554_v58 = vld [vmem:[#allocation3 + $0xf8] sm:$0xff] }
 0x164   : > { %1094 = vst [vmem:[#allocation3 + $0x48] sm:$0xff] %v1062_v60  ;;  %v943_v61 = vpop.f32.mrf.mxu2 }
 0x165   : > { %v1032_v63 = vpop.f32.mrf.mxu3 }
 0x166   : > { %v1033_v0 = vadd.f32 %v1032_v63, %v943_v61  ;;  %v906_v1 = vpop.f32.mrf.mxu0 }
 0x167   : > { %v995_v3 = vpop.f32.mrf.mxu1 }
 0x168   : > { %v1078_v4 = vadd.f32 %v1033_v0, %v548_v62  ;;  %v996_v5 = vadd.f32 %v995_v3, %v906_v1  ;;  %v539_v62 = vld [vmem:[#allocation3 + $0x8] sm:$0xff] }
 0x16a   : > { %1110 = vst [vmem:[#allocation3 + $0xc0] sm:$0xff] %v1078_v4  ;;  %v1063_v6 = vadd.f32 %v996_v5, %v533_v2  ;;  %v555_v4 = vld [vmem:[#allocation3 + $0x20] sm:$0xff] }
 0x16c   : > { %1095 = vst [vmem:[#allocation3 + $0x80] sm:$0xff] %v1063_v6  ;;  %v946_v7 = vpop.f32.mrf.mxu2 }
 0x16d   : > { %v1035_v9 = vpop.f32.mrf.mxu3 }
 0x16e   : > { %v1036_v10 = vadd.f32 %v1035_v9, %v946_v7  ;;  %v908_v11 = vpop.f32.mrf.mxu0 }
 0x16f   : > { %v997_v13 = vpop.f32.mrf.mxu1 }
 0x170   : > { %v1079_v14 = vadd.f32 %v1036_v10, %v549_v8  ;;  %v998_v15 = vadd.f32 %v997_v13, %v908_v11  ;;  %v540_v8 = vld [vmem:[#allocation3 + $0x78] sm:$0xff] }
 0x172   : > { %1111 = vst [vmem:[#allocation3 + $0xa8] sm:$0xff] %v1079_v14  ;;  %v1064_v16 = vadd.f32 %v998_v15, %v534_v12  ;;  %v556_v14 = vld [vmem:[#allocation3 + $0x98] sm:$0xff] }
 0x174   : > { %1096 = vst [vmem:[#allocation3 + $0x88] sm:$0xff] %v1064_v16  ;;  %v948_v17 = vpop.f32.mrf.mxu2 }
 0x175   : > { %v1037_v19 = vpop.f32.mrf.mxu3 }
 0x176   : > { %v1038_v20 = vadd.f32 %v1037_v19, %v948_v17  ;;  %v911_v21 = vpop.f32.mrf.mxu0 }
 0x177   : > { %v1000_v23 = vpop.f32.mrf.mxu1 }
 0x178   : > { %v1080_v24 = vadd.f32 %v1038_v20, %v550_v18  ;;  %v1001_v25 = vadd.f32 %v1000_v23, %v911_v21 }
 0x17a   : > { %1112 = vst [vmem:[#allocation3 + $0xd0] sm:$0xff] %v1080_v24  ;;  %v1065_v26 = vadd.f32 %v1001_v25, %v535_v22 }
 0x17c   : > { %1097 = vst [vmem:[#allocation3 + $0xe8] sm:$0xff] %v1065_v26  ;;  %v951_v27 = vpop.f32.mrf.mxu2 }
 0x17d   : > { %v1040_v29 = vpop.f32.mrf.mxu3 }
 0x17e   : > { %v1041_v30 = vadd.f32 %v1040_v29, %v951_v27  ;;  %v913_v31 = vpop.f32.mrf.mxu0 }
 0x17f   : > { %v1002_v33 = vpop.f32.mrf.mxu1 }
 0x180   : > { %v1081_v34 = vadd.f32 %v1041_v30, %v551_v28  ;;  %v1003_v35 = vadd.f32 %v1002_v33, %v913_v31 }
 0x182   : > { %1113 = vst [vmem:[#allocation3 + $0x10] sm:$0xff] %v1081_v34  ;;  %v1066_v36 = vadd.f32 %v1003_v35, %v536_v32 }
 0x184   : > { %1098 = vst [vmem:[#allocation3 + $0xb8] sm:$0xff] %v1066_v36  ;;  %v953_v37 = vpop.f32.mrf.mxu2 }
 0x185   : > { %v1042_v39 = vpop.f32.mrf.mxu3 }
 0x186   : > { %v1043_v40 = vadd.f32 %v1042_v39, %v953_v37  ;;  %v916_v41 = vpop.f32.mrf.mxu0 }
 0x187   : > { %v1005_v43 = vpop.f32.mrf.mxu1 }
 0x188   : > { %v1082_v44 = vadd.f32 %v1043_v40, %v552_v38  ;;  %v1006_v45 = vadd.f32 %v1005_v43, %v916_v41 }
 0x18a   : > { %1114 = vst [vmem:[#allocation3 + $0x28] sm:$0xff] %v1082_v44  ;;  %v1067_v46 = vadd.f32 %v1006_v45, %v537_v42 }
 0x18c   : > { %1099 = vst [vmem:[#allocation3 + $0x60] sm:$0xff] %v1067_v46  ;;  %v956_v47 = vpop.f32.mrf.mxu2 }
 0x18d   : > { %v1045_v49 = vpop.f32.mrf.mxu3 }
 0x18e   : > { %v1046_v50 = vadd.f32 %v1045_v49, %v956_v47  ;;  %v918_v51 = vpop.f32.mrf.mxu0 }
 0x18f   : > { %v1007_v53 = vpop.f32.mrf.mxu1 }
 0x190   : > { %v1083_v54 = vadd.f32 %v1046_v50, %v553_v48  ;;  %v1008_v55 = vadd.f32 %v1007_v53, %v918_v51 }
 0x192   : > { %1115 = vst [vmem:[#allocation3 + $0xa0] sm:$0xff] %v1083_v54  ;;  %v1068_v56 = vadd.f32 %v1008_v55, %v538_v52 }
 0x194   : > { %1100 = vst [vmem:[#allocation3 + $0xf0] sm:$0xff] %v1068_v56  ;;  %v958_v57 = vpop.f32.mrf.mxu2 }
 0x195   : > { %v1047_v59 = vpop.f32.mrf.mxu3 }
 0x196   : > { %v1048_v60 = vadd.f32 %v1047_v59, %v958_v57  ;;  %v921_v61 = vpop.f32.mrf.mxu0 }
 0x197   : > { %v1010_v63 = vpop.f32.mrf.mxu1 }
 0x198   : > { %v1084_v0 = vadd.f32 %v1048_v60, %v554_v58  ;;  %v1011_v1 = vadd.f32 %v1010_v63, %v921_v61 }
 0x19a   : > { %1116 = vst [vmem:[#allocation3 + $0xf8] sm:$0xff] %v1084_v0  ;;  %v1069_v2 = vadd.f32 %v1011_v1, %v539_v62 }
 0x19c   : > { %1101 = vst [vmem:[#allocation3 + $0x8] sm:$0xff] %v1069_v2  ;;  %v961_v3 = vpop.f32.mrf.mxu2 }
 0x19d   : > { %v1050_v5 = vpop.f32.mrf.mxu3 }
 0x19e   : > { %v1051_v6 = vadd.f32 %v1050_v5, %v961_v3  ;;  %v923_v7 = vpop.f32.mrf.mxu0 }
 0x19f   : > { %v1012_v9 = vpop.f32.mrf.mxu1 }
 0x1a0   : > { %v1085_v10 = vadd.f32 %v1051_v6, %v555_v4  ;;  %v1013_v11 = vadd.f32 %v1012_v9, %v923_v7 }
 0x1a2   : > { %1117 = vst [vmem:[#allocation3 + $0x20] sm:$0xff] %v1085_v10  ;;  %v1070_v12 = vadd.f32 %v1013_v11, %v540_v8 }
 0x1a4   : > { %1102 = vst [vmem:[#allocation3 + $0x78] sm:$0xff] %v1070_v12  ;;  %v963_v13 = vpop.f32.mrf.mxu2 }
 0x1a5   : > { %v1052_v15 = vpop.f32.mrf.mxu3 }
 0x1a6   : > { %v1053_v16 = vadd.f32 %v1052_v15, %v963_v13 }
 0x1a8   : > { %v1086_v17 = vadd.f32 %v1053_v16, %v556_v14 }
 0x1aa   : > { %1118 = vst [vmem:[#allocation3 + $0x98] sm:$0xff] %v1086_v17 }
 0x1ab PF: > { %p1119_p13 = scmp.gt.s32.totalorder %s3295_s3, 0 }
 0x1ad   : > { %p1120_p1 = pnand %p2271_p0, %p1119_p13 }
 0x1ae   : > { %s1124_s16 = sadd.s32 (!%p1120_p1), 1, %s3295_s3 }
 0x1af   : > { %1123 = sbr.rel (%p1120_p1) target bundleno = 730 (0x2da), region = 68  ;;  %p1125_p2 = scmp.lt.s32.totalorder (!%p1120_p1), %s1124_s16, 0 }
 0x1b0   : > { %s1126_s12 = ssub.s32 (!%p1120_p1), 0, %s1124_s16 }
 0x1b1   : > { %s2464_s25 = smin.u32 (!%p1120_p1), %s1126_s12, %s1124_s16 }
 0x1b2   : > { %s1128_s14 = sand.u32 (!%p1120_p1), 1, %s2464_s25  }
 0x1b3   : > { %s1129_s18 = ssub.s32 (!%p1120_p1), 0, %s1128_s14 }
 0x1b4   : > { %s3749_s18 = smov (!%p1125_p2, %s1129_s18), %s1128_s14  ;;  %v2469_v32 = vld [vmem:[#allocation12] sm:$0xf]  ;;  %v2753_v35 = vld [vmem:[#allocation12 + $0x4] sm:$0xf0]  ;;  %v2752_v38 = vld [vmem:[#allocation12 + $0x4] sm:$0xf] }
 0x1b5   : > { %s1195_s5 = sadd.s32 %s3749_s18, %s3534_s11  ;;  %v2533_v36 = vld [vmem:[#allocation12 + $0x80] sm:$0xf]  ;;  %v2769_v37 = vld [vmem:[#allocation12 + $0x84] sm:$0xf0]  ;;  %v2471_v39 = vld [vmem:[#allocation12 + $0x8] sm:$0xf0]  ;;  %v2470_v42 = vor.u32 %v2753_v35, %v2469_v32 }
 0x1b6   : > { %s2784_s6 = sshll.u32 %s1195_s5, 7  ;;  %v2768_v40 = vld [vmem:[#allocation12 + $0x84] sm:$0xf]  ;;  %v2535_v41 = vld [vmem:[#allocation12 + $0x88] sm:$0xf0]  ;;  %v2534_v43 = vor.u32 %v2769_v37, %v2533_v36  ;;  %v2474_v44 = vor.u32 %v2752_v38, %v2471_v39 }
 0x1b7   : > { %s3575_s30 = scalar_lea.vmem [#allocation2], %s2784_s6  ;;  %v2538_v45 = vor.u32 %v2768_v40, %v2535_v41  ;;  %v2477_v46 = vld [vmem:[#allocation12 + $0x10] sm:$0xf]  ;;  %v2755_v47 = vld [vmem:[#allocation12 + $0x14] sm:$0xf0] }
 0x1b8   : > { %v2792_v18 = vld [vmem:[%s3575_s30 + $0x38] sm:$0xff]  ;;  %v2791_v20 = vld [vmem:[%s3575_s30 + $0x30] sm:$0xff]  ;;  %v2790_v22 = vld [vmem:[%s3575_s30 + $0x28] sm:$0xff]  ;;  %v2478_v54 = vor.u32 %v2755_v47, %v2477_v46 }
 0x1b9   : > { %v2800_v19 = vld [vmem:[%s3575_s30 + $0x78] sm:$0xff]  ;;  %1487 = vmatpush.bf16.msra.mxu0 %v2792_v18  ;;  %2921 = vmatpush.bf16.msra.mxu2 %v2792_v18  ;;  %v2799_v21 = vld [vmem:[%s3575_s30 + $0x70] sm:$0xff]  ;;  %v2798_v23 = vld [vmem:[%s3575_s30 + $0x68] sm:$0xff] }
 0x1ba   : > { %1576 = vmatpush.bf16.msra.mxu1 %v2800_v19  ;;  %2929 = vmatpush.bf16.msra.mxu3 %v2800_v19  ;;  %v2789_v24 = vld [vmem:[%s3575_s30 + $0x20] sm:$0xff]  ;;  %v2788_v26 = vld [vmem:[%s3575_s30 + $0x18] sm:$0xff]  ;;  %v2787_v28 = vld [vmem:[%s3575_s30 + $0x10] sm:$0xff] }
 0x1bb   : > { %v2797_v25 = vld [vmem:[%s3575_s30 + $0x60] sm:$0xff]  ;;  %v2796_v27 = vld [vmem:[%s3575_s30 + $0x58] sm:$0xff]  ;;  %v2795_v29 = vld [vmem:[%s3575_s30 + $0x50] sm:$0xff] }
 0x1bc   : > { %v2786_v30 = vld [vmem:[%s3575_s30 + $0x8] sm:$0xff]  ;;  %v2785_v33 = vld [vmem:[%s3575_s30] sm:$0xff]  ;;  %v2541_v48 = vld [vmem:[#allocation12 + $0x90] sm:$0xf] }
 0x1bd   : > { %1488 = vmatpush.bf16.msra.mxu0 %v2791_v20  ;;  %2922 = vmatpush.bf16.msra.mxu2 %v2791_v20  ;;  %v2794_v31 = vld [vmem:[%s3575_s30 + $0x48] sm:$0xff]  ;;  %v2793_v34 = vld [vmem:[%s3575_s30 + $0x40] sm:$0xff]  ;;  %v2771_v49 = vld [vmem:[#allocation12 + $0x94] sm:$0xf0] }
 0x1be   : > { %1577 = vmatpush.bf16.msra.mxu1 %v2799_v21  ;;  %2930 = vmatpush.bf16.msra.mxu3 %v2799_v21  ;;  %v2754_v50 = vld [vmem:[#allocation12 + $0x14] sm:$0xf]  ;;  %v2479_v51 = vld [vmem:[#allocation12 + $0x18] sm:$0xf0]  ;;  %v2542_v55 = vor.u32 %v2771_v49, %v2541_v48  ;;  %v2485_v58 = vld [vmem:[#allocation12 + $0x20] sm:$0xf] }
 0x1bf   : > { %v2770_v52 = vld [vmem:[#allocation12 + $0x94] sm:$0xf]  ;;  %v2543_v53 = vld [vmem:[#allocation12 + $0x98] sm:$0xf0]  ;;  %v2482_v56 = vor.u32 %v2754_v50, %v2479_v51  ;;  %v2757_v59 = vld [vmem:[#allocation12 + $0x24] sm:$0xf0] }
 0x1c0   : > { %v2546_v57 = vor.u32 %v2770_v52, %v2543_v53  ;;  %v2549_v60 = vld [vmem:[#allocation12 + $0xa0] sm:$0xf]  ;;  %v2773_v61 = vld [vmem:[#allocation12 + $0xa4] sm:$0xf0]  ;;  %v2756_v62 = vld [vmem:[#allocation12 + $0x24] sm:$0xf]  ;;  %v2486_v2 = vor.u32 %v2757_v59, %v2485_v58 }
 0x1c1   : > { %1489 = vmatpush.bf16.msra.mxu0 %v2790_v22  ;;  %2923 = vmatpush.bf16.msra.mxu2 %v2790_v22  ;;  %v2487_v63 = vld [vmem:[#allocation12 + $0x28] sm:$0xf0]  ;;  %v2772_v0 = vld [vmem:[#allocation12 + $0xa4] sm:$0xf]  ;;  %v2550_v3 = vor.u32 %v2773_v61, %v2549_v60  ;;  %v2493_v6 = vld [vmem:[#allocation12 + $0x30] sm:$0xf] }
 0x1c2   : > { %1578 = vmatpush.bf16.msra.mxu1 %v2798_v23  ;;  %2931 = vmatpush.bf16.msra.mxu3 %v2798_v23  ;;  %v2551_v1 = vld [vmem:[#allocation12 + $0xa8] sm:$0xf0]  ;;  %v2490_v4 = vor.u32 %v2756_v62, %v2487_v63  ;;  %v2759_v7 = vld [vmem:[#allocation12 + $0x34] sm:$0xf0]  ;;  %v2557_v8 = vld [vmem:[#allocation12 + $0xb0] sm:$0xf] }
 0x1c3   : > { %v2554_v5 = vor.u32 %v2772_v0, %v2551_v1  ;;  %v2775_v9 = vld [vmem:[#allocation12 + $0xb4] sm:$0xf0]  ;;  %v2758_v10 = vld [vmem:[#allocation12 + $0x34] sm:$0xf]  ;;  %v2495_v11 = vld [vmem:[#allocation12 + $0x38] sm:$0xf0]  ;;  %v2494_v14 = vor.u32 %v2759_v7, %v2493_v6 }
 0x1c4   : > { %v2774_v12 = vld [vmem:[#allocation12 + $0xb4] sm:$0xf]  ;;  %v2559_v13 = vld [vmem:[#allocation12 + $0xb8] sm:$0xf0]  ;;  %v2558_v15 = vor.u32 %v2775_v9, %v2557_v8  ;;  %v2498_v16 = vor.u32 %v2758_v10, %v2495_v11  ;;  %v2501_v18 = vld [vmem:[#allocation12 + $0x40] sm:$0xf] }
 0x1c5   : > { %1490 = vmatpush.bf16.msra.mxu0 %v2789_v24  ;;  %2924 = vmatpush.bf16.msra.mxu2 %v2789_v24  ;;  %v2562_v17 = vor.u32 %v2774_v12, %v2559_v13  ;;  %v2761_v19 = vld [vmem:[#allocation12 + $0x44] sm:$0xf0]  ;;  %v2565_v20 = vld [vmem:[#allocation12 + $0xc0] sm:$0xf]  ;;  %v2760_v22 = vld [vmem:[#allocation12 + $0x44] sm:$0xf] }
 0x1c6   : > { %1579 = vmatpush.bf16.msra.mxu1 %v2797_v25  ;;  %2932 = vmatpush.bf16.msra.mxu3 %v2797_v25  ;;  %v2777_v21 = vld [vmem:[#allocation12 + $0xc4] sm:$0xf0]  ;;  %v2503_v23 = vld [vmem:[#allocation12 + $0x48] sm:$0xf0]  ;;  %v2776_v24 = vld [vmem:[#allocation12 + $0xc4] sm:$0xf] }
 0x1c7   : > { %v2567_v25 = vld [vmem:[#allocation12 + $0xc8] sm:$0xf0]  ;;  %v2573_v32 = vld [vmem:[#allocation12 + $0xd0] sm:$0xf]  ;;  %v2511_v35 = vld [vmem:[#allocation12 + $0x58] sm:$0xf0] }
 0x1c8   : > { %v2778_v36 = vld [vmem:[#allocation12 + $0xd4] sm:$0xf]  ;;  %v2575_v37 = vld [vmem:[#allocation12 + $0xd8] sm:$0xf0]  ;;  %v2764_v46 = vld [vmem:[#allocation12 + $0x64] sm:$0xf] }
 0x1c9   : > { %1491 = vmatpush.bf16.msra.mxu0 %v2788_v26  ;;  %2925 = vmatpush.bf16.msra.mxu2 %v2788_v26  ;;  %v2502_v26 = vor.u32 %v2761_v19, %v2501_v18  ;;  %v2578_v41 = vor.u32 %v2778_v36, %v2575_v37  ;;  %v2519_v47 = vld [vmem:[#allocation12 + $0x68] sm:$0xf0]  ;;  %v2780_v48 = vld [vmem:[#allocation12 + $0xe4] sm:$0xf]  ;;  %v2766_v58 = vld [vmem:[#allocation12 + $0x74] sm:$0xf] }
 0x1ca   : > { %1580 = vmatpush.bf16.msra.mxu1 %v2796_v27  ;;  %2933 = vmatpush.bf16.msra.mxu3 %v2796_v27  ;;  %v2566_v27 = vor.u32 %v2777_v21, %v2565_v20  ;;  %v2583_v49 = vld [vmem:[#allocation12 + $0xe8] sm:$0xf0]  ;;  %v2522_v52 = vor.u32 %v2764_v46, %v2519_v47  ;;  %v2527_v59 = vld [vmem:[#allocation12 + $0x78] sm:$0xf0]  ;;  %v2782_v60 = vld [vmem:[#allocation12 + $0xf4] sm:$0xf] }
 0x1cb   : > { %v2586_v53 = vor.u32 %v2780_v48, %v2583_v49  ;;  %v2591_v61 = vld [vmem:[#allocation12 + $0xf8] sm:$0xf0]  ;;  %v2530_v0 = vor.u32 %v2766_v58, %v2527_v59  ;;  %v1132_v12 = vld [vmem:[#allocation3] sm:$0xff]  ;;  %v1152_v58 = vld [vmem:[#allocation3 + $0x90] sm:$0xff] }
 0x1cc   : > { %v2594_v1 = vor.u32 %v2782_v60, %v2591_v61  ;;  %v1147_v8 = vld [vmem:[#allocation3 + $0x38] sm:$0xff]  ;;  %v1151_v48 = vld [vmem:[#allocation3 + $0xe0] sm:$0xff] }
 0x1cd   : > { %1492 = vmatpush.bf16.msra.mxu0 %v2787_v28  ;;  %2926 = vmatpush.bf16.msra.mxu2 %v2787_v28  ;;  %v2506_v28 = vor.u32 %v2760_v22, %v2503_v23  ;;  %v1148_v18 = vld [vmem:[#allocation3 + $0x58] sm:$0xff] }
 0x1ce   : > { %1581 = vmatpush.bf16.msra.mxu1 %v2795_v29  ;;  %2934 = vmatpush.bf16.msra.mxu3 %v2795_v29  ;;  %v2570_v29 = vor.u32 %v2776_v24, %v2567_v25  ;;  %v1133_v22 = vld [vmem:[#allocation3 + $0xd8] sm:$0xff] }
 0x1d1   : > { %1493 = vmatpush.bf16.msra.mxu0 %v2786_v30  ;;  %2927 = vmatpush.bf16.msra.mxu2 %v2786_v30  ;;  %v2509_v30 = vld [vmem:[#allocation12 + $0x50] sm:$0xf] }
 0x1d2   : > { %1582 = vmatpush.bf16.msra.mxu1 %v2794_v31  ;;  %2935 = vmatpush.bf16.msra.mxu3 %v2794_v31  ;;  %v2763_v31 = vld [vmem:[#allocation12 + $0x54] sm:$0xf0] }
 0x1d3   : > { %v2510_v38 = vor.u32 %v2763_v31, %v2509_v30 }
 0x1d5   : > { %1494 = vmatpush.bf16.msra.mxu0 %v2785_v33  ;;  %2928 = vmatpush.bf16.msra.mxu2 %v2785_v33  ;;  %v2779_v33 = vld [vmem:[#allocation12 + $0xd4] sm:$0xf0] }
 0x1d6   : > { %1583 = vmatpush.bf16.msra.mxu1 %v2793_v34  ;;  %2936 = vmatpush.bf16.msra.mxu3 %v2793_v34  ;;  %v2762_v34 = vld [vmem:[#allocation12 + $0x54] sm:$0xf]  ;;  %v2574_v39 = vor.u32 %v2779_v33, %v2573_v32  ;;  %v1134_v32 = vld [vmem:[#allocation3 + $0x18] sm:$0xff] }
 0x1d7   : > { %v2514_v40 = vor.u32 %v2762_v34, %v2511_v35 }
 0x1d8   : > { %1495 = vmatmul.bf16.vlgmr.msra.gmra.mxu0 %v2470_v42  ;;  %1535 = vmatmul.bf16.vlgmr.msra.gmra.mxu2 %v2534_v43  ;;  %v2517_v42 = vld [vmem:[#allocation12 + $0x60] sm:$0xf]  ;;  %v2765_v43 = vld [vmem:[#allocation12 + $0x64] sm:$0xf0] }
 0x1d9   : > { %1584 = vmatmul.bf16.vlgmr.msra.gmra.mxu1 %v2474_v44  ;;  %1624 = vmatmul.bf16.vlgmr.msra.gmra.mxu3 %v2538_v45  ;;  %v2581_v44 = vld [vmem:[#allocation12 + $0xe0] sm:$0xf]  ;;  %v2781_v45 = vld [vmem:[#allocation12 + $0xe4] sm:$0xf0]  ;;  %v2518_v50 = vor.u32 %v2765_v43, %v2517_v42  ;;  %v1135_v42 = vld [vmem:[#allocation3 + $0x50] sm:$0xff] }
 0x1da   : > { %v2582_v51 = vor.u32 %v2781_v45, %v2581_v44 }
 0x1e8   : > { %1500 = vmatmul.bf16.gmra.mxu0 %v2478_v54  ;;  %1540 = vmatmul.bf16.gmra.mxu2 %v2542_v55  ;;  %v2525_v54 = vld [vmem:[#allocation12 + $0x70] sm:$0xf]  ;;  %v2767_v55 = vld [vmem:[#allocation12 + $0x74] sm:$0xf0] }
 0x1e9   : > { %1589 = vmatmul.bf16.gmra.mxu1 %v2482_v56  ;;  %1629 = vmatmul.bf16.gmra.mxu3 %v2546_v57  ;;  %v2589_v56 = vld [vmem:[#allocation12 + $0xf0] sm:$0xf]  ;;  %v2783_v57 = vld [vmem:[#allocation12 + $0xf4] sm:$0xf0]  ;;  %v2526_v62 = vor.u32 %v2767_v55, %v2525_v54 }
 0x1ea   : > { %v2590_v63 = vor.u32 %v2783_v57, %v2589_v56 }
 0x1f8   : > { %1505 = vmatmul.bf16.gmra.mxu0 %v2486_v2  ;;  %1545 = vmatmul.bf16.gmra.mxu2 %v2550_v3  ;;  %v1131_v3 = vld [vmem:[#allocation3 + $0xb0] sm:$0xff] }
 0x1f9   : > { %1594 = vmatmul.bf16.gmra.mxu1 %v2490_v4  ;;  %1634 = vmatmul.bf16.gmra.mxu3 %v2554_v5 }
 0x208   : > { %1510 = vmatmul.bf16.gmra.mxu0 %v2494_v14  ;;  %1550 = vmatmul.bf16.gmra.mxu2 %v2558_v15 }
 0x209   : > { %1599 = vmatmul.bf16.gmra.mxu1 %v2498_v16  ;;  %1639 = vmatmul.bf16.gmra.mxu3 %v2562_v17 }
 0x218   : > { %1515 = vmatmul.bf16.gmra.mxu0 %v2502_v26  ;;  %1555 = vmatmul.bf16.gmra.mxu2 %v2566_v27 }
 0x219   : > { %1604 = vmatmul.bf16.gmra.mxu1 %v2506_v28  ;;  %1644 = vmatmul.bf16.gmra.mxu3 %v2570_v29  ;;  %v1149_v28 = vld [vmem:[#allocation3 + $0x40] sm:$0xff] }
 0x228   : > { %1520 = vmatmul.bf16.gmra.mxu0 %v2510_v38  ;;  %1560 = vmatmul.bf16.gmra.mxu2 %v2574_v39  ;;  %v1150_v38 = vld [vmem:[#allocation3 + $0xc8] sm:$0xff] }
 0x229   : > { %1609 = vmatmul.bf16.gmra.mxu1 %v2514_v40  ;;  %1649 = vmatmul.bf16.gmra.mxu3 %v2578_v41 }
 0x238   : > { %1525 = vmatmul.bf16.gmra.mxu0 %v2518_v50  ;;  %1565 = vmatmul.bf16.gmra.mxu2 %v2582_v51 }
 0x239   : > { %1614 = vmatmul.bf16.gmra.mxu1 %v2522_v52  ;;  %1654 = vmatmul.bf16.gmra.mxu3 %v2586_v53  ;;  %v1136_v52 = vld [vmem:[#allocation3 + $0x68] sm:$0xff] }
 0x248   : > { %1530 = vmatmul.bf16.gmra.mxu0 %v2526_v62  ;;  %1570 = vmatmul.bf16.gmra.mxu2 %v2590_v63  ;;  %v1137_v62 = vld [vmem:[#allocation3 + $0x30] sm:$0xff] }
 0x249   : > { %1619 = vmatmul.bf16.gmra.mxu1 %v2530_v0  ;;  %1659 = vmatmul.bf16.gmra.mxu3 %v2594_v1 }
 0x255   : > { %v1496_v2 = vpop.f32.mrf.mxu0 }
 0x256   : > { %v1585_v4 = vpop.f32.mrf.mxu1 }
 0x257   : > { %v1586_v5 = vadd.f32 %v1585_v4, %v1496_v2  ;;  %v1153_v4 = vld [vmem:[#allocation3 + $0x70] sm:$0xff] }
 0x259   : > { %v1665_v6 = vadd.f32 %v1586_v5, %v1131_v3 }
 0x25b   : > { %1697 = vst [vmem:[#allocation3 + $0xb0] sm:$0xff] %v1665_v6  ;;  %v1536_v7 = vpop.f32.mrf.mxu2 }
 0x25c   : > { %v1625_v9 = vpop.f32.mrf.mxu3 }
 0x25d   : > { %v1626_v10 = vadd.f32 %v1625_v9, %v1536_v7  ;;  %v1498_v11 = vpop.f32.mrf.mxu0 }
 0x25e   : > { %v1587_v13 = vpop.f32.mrf.mxu1 }
 0x25f   : > { %v1681_v14 = vadd.f32 %v1626_v10, %v1147_v8  ;;  %v1588_v15 = vadd.f32 %v1587_v13, %v1498_v11  ;;  %v1138_v8 = vld [vmem:[#allocation3 + $0x48] sm:$0xff] }
 0x261   : > { %1713 = vst [vmem:[#allocation3 + $0x38] sm:$0xff] %v1681_v14  ;;  %v1666_v16 = vadd.f32 %v1588_v15, %v1132_v12  ;;  %v1154_v14 = vld [vmem:[#allocation3 + $0xc0] sm:$0xff] }
 0x263   : > { %1698 = vst [vmem:[#allocation3] sm:$0xff] %v1666_v16  ;;  %v1538_v17 = vpop.f32.mrf.mxu2 }
 0x264   : > { %v1627_v19 = vpop.f32.mrf.mxu3 }
 0x265   : > { %v1628_v20 = vadd.f32 %v1627_v19, %v1538_v17  ;;  %v1501_v21 = vpop.f32.mrf.mxu0 }
 0x266   : > { %v1590_v23 = vpop.f32.mrf.mxu1 }
 0x267   : > { %v1682_v24 = vadd.f32 %v1628_v20, %v1148_v18  ;;  %v1591_v25 = vadd.f32 %v1590_v23, %v1501_v21  ;;  %v1139_v18 = vld [vmem:[#allocation3 + $0x80] sm:$0xff] }
 0x269   : > { %1714 = vst [vmem:[#allocation3 + $0x58] sm:$0xff] %v1682_v24  ;;  %v1667_v26 = vadd.f32 %v1591_v25, %v1133_v22  ;;  %v1155_v24 = vld [vmem:[#allocation3 + $0xa8] sm:$0xff] }
 0x26b   : > { %1699 = vst [vmem:[#allocation3 + $0xd8] sm:$0xff] %v1667_v26  ;;  %v1541_v27 = vpop.f32.mrf.mxu2 }
 0x26c   : > { %v1630_v29 = vpop.f32.mrf.mxu3 }
 0x26d   : > { %v1631_v30 = vadd.f32 %v1630_v29, %v1541_v27  ;;  %v1503_v31 = vpop.f32.mrf.mxu0 }
 0x26e   : > { %v1592_v33 = vpop.f32.mrf.mxu1 }
 0x26f   : > { %v1683_v34 = vadd.f32 %v1631_v30, %v1149_v28  ;;  %v1593_v35 = vadd.f32 %v1592_v33, %v1503_v31  ;;  %v1140_v28 = vld [vmem:[#allocation3 + $0x88] sm:$0xff] }
 0x271   : > { %1715 = vst [vmem:[#allocation3 + $0x40] sm:$0xff] %v1683_v34  ;;  %v1668_v36 = vadd.f32 %v1593_v35, %v1134_v32  ;;  %v1156_v34 = vld [vmem:[#allocation3 + $0xd0] sm:$0xff] }
 0x273   : > { %1700 = vst [vmem:[#allocation3 + $0x18] sm:$0xff] %v1668_v36  ;;  %v1543_v37 = vpop.f32.mrf.mxu2 }
 0x274   : > { %v1632_v39 = vpop.f32.mrf.mxu3 }
 0x275   : > { %v1633_v40 = vadd.f32 %v1632_v39, %v1543_v37  ;;  %v1506_v41 = vpop.f32.mrf.mxu0 }
 0x276   : > { %v1595_v43 = vpop.f32.mrf.mxu1 }
 0x277   : > { %v1684_v44 = vadd.f32 %v1633_v40, %v1150_v38  ;;  %v1596_v45 = vadd.f32 %v1595_v43, %v1506_v41  ;;  %v1141_v38 = vld [vmem:[#allocation3 + $0xe8] sm:$0xff] }
 0x279   : > { %1716 = vst [vmem:[#allocation3 + $0xc8] sm:$0xff] %v1684_v44  ;;  %v1669_v46 = vadd.f32 %v1596_v45, %v1135_v42  ;;  %v1157_v44 = vld [vmem:[#allocation3 + $0x10] sm:$0xff] }
 0x27b   : > { %1701 = vst [vmem:[#allocation3 + $0x50] sm:$0xff] %v1669_v46  ;;  %v1546_v47 = vpop.f32.mrf.mxu2 }
 0x27c   : > { %v1635_v49 = vpop.f32.mrf.mxu3 }
 0x27d   : > { %v1636_v50 = vadd.f32 %v1635_v49, %v1546_v47  ;;  %v1508_v51 = vpop.f32.mrf.mxu0 }
 0x27e   : > { %v1597_v53 = vpop.f32.mrf.mxu1 }
 0x27f   : > { %v1685_v54 = vadd.f32 %v1636_v50, %v1151_v48  ;;  %v1598_v55 = vadd.f32 %v1597_v53, %v1508_v51  ;;  %v1142_v48 = vld [vmem:[#allocation3 + $0xb8] sm:$0xff] }
 0x281   : > { %1717 = vst [vmem:[#allocation3 + $0xe0] sm:$0xff] %v1685_v54  ;;  %v1670_v56 = vadd.f32 %v1598_v55, %v1136_v52  ;;  %v1158_v54 = vld [vmem:[#allocation3 + $0x28] sm:$0xff] }
 0x283   : > { %1702 = vst [vmem:[#allocation3 + $0x68] sm:$0xff] %v1670_v56  ;;  %v1548_v57 = vpop.f32.mrf.mxu2 }
 0x284   : > { %v1637_v59 = vpop.f32.mrf.mxu3 }
 0x285   : > { %v1638_v60 = vadd.f32 %v1637_v59, %v1548_v57  ;;  %v1511_v61 = vpop.f32.mrf.mxu0 }
 0x286   : > { %v1600_v63 = vpop.f32.mrf.mxu1 }
 0x287   : > { %v1686_v0 = vadd.f32 %v1638_v60, %v1152_v58  ;;  %v1601_v1 = vadd.f32 %v1600_v63, %v1511_v61  ;;  %v1143_v58 = vld [vmem:[#allocation3 + $0x60] sm:$0xff] }
 0x289   : > { %1718 = vst [vmem:[#allocation3 + $0x90] sm:$0xff] %v1686_v0  ;;  %v1671_v2 = vadd.f32 %v1601_v1, %v1137_v62  ;;  %v1159_v0 = vld [vmem:[#allocation3 + $0xa0] sm:$0xff] }
 0x28b   : > { %1703 = vst [vmem:[#allocation3 + $0x30] sm:$0xff] %v1671_v2  ;;  %v1551_v3 = vpop.f32.mrf.mxu2 }
 0x28c   : > { %v1640_v5 = vpop.f32.mrf.mxu3 }
 0x28d   : > { %v1641_v6 = vadd.f32 %v1640_v5, %v1551_v3  ;;  %v1513_v7 = vpop.f32.mrf.mxu0 }
 0x28e   : > { %v1602_v9 = vpop.f32.mrf.mxu1 }
 0x28f   : > { %v1687_v10 = vadd.f32 %v1641_v6, %v1153_v4  ;;  %v1603_v11 = vadd.f32 %v1602_v9, %v1513_v7  ;;  %v1144_v4 = vld [vmem:[#allocation3 + $0xf0] sm:$0xff] }
 0x291   : > { %1719 = vst [vmem:[#allocation3 + $0x70] sm:$0xff] %v1687_v10  ;;  %v1672_v12 = vadd.f32 %v1603_v11, %v1138_v8  ;;  %v1160_v10 = vld [vmem:[#allocation3 + $0xf8] sm:$0xff] }
 0x293   : > { %1704 = vst [vmem:[#allocation3 + $0x48] sm:$0xff] %v1672_v12  ;;  %v1553_v13 = vpop.f32.mrf.mxu2 }
 0x294   : > { %v1642_v15 = vpop.f32.mrf.mxu3 }
 0x295   : > { %v1643_v16 = vadd.f32 %v1642_v15, %v1553_v13  ;;  %v1516_v17 = vpop.f32.mrf.mxu0 }
 0x296   : > { %v1605_v19 = vpop.f32.mrf.mxu1 }
 0x297   : > { %v1688_v20 = vadd.f32 %v1643_v16, %v1154_v14  ;;  %v1606_v21 = vadd.f32 %v1605_v19, %v1516_v17  ;;  %v1145_v14 = vld [vmem:[#allocation3 + $0x8] sm:$0xff] }
 0x299   : > { %1720 = vst [vmem:[#allocation3 + $0xc0] sm:$0xff] %v1688_v20  ;;  %v1673_v22 = vadd.f32 %v1606_v21, %v1139_v18  ;;  %v1161_v20 = vld [vmem:[#allocation3 + $0x20] sm:$0xff] }
 0x29b   : > { %1705 = vst [vmem:[#allocation3 + $0x80] sm:$0xff] %v1673_v22  ;;  %v1556_v23 = vpop.f32.mrf.mxu2 }
 0x29c   : > { %v1645_v25 = vpop.f32.mrf.mxu3 }
 0x29d   : > { %v1646_v26 = vadd.f32 %v1645_v25, %v1556_v23  ;;  %v1518_v27 = vpop.f32.mrf.mxu0 }
 0x29e   : > { %v1607_v29 = vpop.f32.mrf.mxu1 }
 0x29f   : > { %v1689_v30 = vadd.f32 %v1646_v26, %v1155_v24  ;;  %v1608_v31 = vadd.f32 %v1607_v29, %v1518_v27  ;;  %v1146_v24 = vld [vmem:[#allocation3 + $0x78] sm:$0xff] }
 0x2a1   : > { %1721 = vst [vmem:[#allocation3 + $0xa8] sm:$0xff] %v1689_v30  ;;  %v1674_v32 = vadd.f32 %v1608_v31, %v1140_v28  ;;  %v1162_v30 = vld [vmem:[#allocation3 + $0x98] sm:$0xff] }
 0x2a3   : > { %1706 = vst [vmem:[#allocation3 + $0x88] sm:$0xff] %v1674_v32  ;;  %v1558_v33 = vpop.f32.mrf.mxu2 }
 0x2a4   : > { %v1647_v35 = vpop.f32.mrf.mxu3 }
 0x2a5   : > { %v1648_v36 = vadd.f32 %v1647_v35, %v1558_v33  ;;  %v1521_v37 = vpop.f32.mrf.mxu0 }
 0x2a6   : > { %v1610_v39 = vpop.f32.mrf.mxu1 }
 0x2a7   : > { %v1690_v40 = vadd.f32 %v1648_v36, %v1156_v34  ;;  %v1611_v41 = vadd.f32 %v1610_v39, %v1521_v37 }
 0x2a9   : > { %1722 = vst [vmem:[#allocation3 + $0xd0] sm:$0xff] %v1690_v40  ;;  %v1675_v42 = vadd.f32 %v1611_v41, %v1141_v38 }
 0x2ab   : > { %1707 = vst [vmem:[#allocation3 + $0xe8] sm:$0xff] %v1675_v42  ;;  %v1561_v43 = vpop.f32.mrf.mxu2 }
 0x2ac   : > { %v1650_v45 = vpop.f32.mrf.mxu3 }
 0x2ad   : > { %v1651_v46 = vadd.f32 %v1650_v45, %v1561_v43  ;;  %v1523_v47 = vpop.f32.mrf.mxu0 }
 0x2ae   : > { %v1612_v49 = vpop.f32.mrf.mxu1 }
 0x2af   : > { %v1691_v50 = vadd.f32 %v1651_v46, %v1157_v44  ;;  %v1613_v51 = vadd.f32 %v1612_v49, %v1523_v47 }
 0x2b1   : > { %1723 = vst [vmem:[#allocation3 + $0x10] sm:$0xff] %v1691_v50  ;;  %v1676_v52 = vadd.f32 %v1613_v51, %v1142_v48 }
 0x2b3   : > { %1708 = vst [vmem:[#allocation3 + $0xb8] sm:$0xff] %v1676_v52  ;;  %v1563_v53 = vpop.f32.mrf.mxu2 }
 0x2b4   : > { %v1652_v55 = vpop.f32.mrf.mxu3 }
 0x2b5   : > { %v1653_v56 = vadd.f32 %v1652_v55, %v1563_v53  ;;  %v1526_v57 = vpop.f32.mrf.mxu0 }
 0x2b6   : > { %v1615_v59 = vpop.f32.mrf.mxu1 }
 0x2b7   : > { %v1692_v60 = vadd.f32 %v1653_v56, %v1158_v54  ;;  %v1616_v61 = vadd.f32 %v1615_v59, %v1526_v57 }
 0x2b9   : > { %1724 = vst [vmem:[#allocation3 + $0x28] sm:$0xff] %v1692_v60  ;;  %v1677_v62 = vadd.f32 %v1616_v61, %v1143_v58 }
 0x2bb   : > { %1709 = vst [vmem:[#allocation3 + $0x60] sm:$0xff] %v1677_v62  ;;  %v1566_v63 = vpop.f32.mrf.mxu2 }
 0x2bc   : > { %v1655_v1 = vpop.f32.mrf.mxu3 }
 0x2bd   : > { %v1656_v2 = vadd.f32 %v1655_v1, %v1566_v63  ;;  %v1528_v3 = vpop.f32.mrf.mxu0 }
 0x2be   : > { %v1617_v5 = vpop.f32.mrf.mxu1 }
 0x2bf   : > { %v1693_v6 = vadd.f32 %v1656_v2, %v1159_v0  ;;  %v1618_v7 = vadd.f32 %v1617_v5, %v1528_v3 }
 0x2c1   : > { %1725 = vst [vmem:[#allocation3 + $0xa0] sm:$0xff] %v1693_v6  ;;  %v1678_v8 = vadd.f32 %v1618_v7, %v1144_v4 }
 0x2c3   : > { %1710 = vst [vmem:[#allocation3 + $0xf0] sm:$0xff] %v1678_v8  ;;  %v1568_v9 = vpop.f32.mrf.mxu2 }
 0x2c4   : > { %v1657_v11 = vpop.f32.mrf.mxu3 }
 0x2c5   : > { %v1658_v12 = vadd.f32 %v1657_v11, %v1568_v9  ;;  %v1531_v13 = vpop.f32.mrf.mxu0 }
 0x2c6   : > { %v1620_v15 = vpop.f32.mrf.mxu1 }
 0x2c7   : > { %v1694_v16 = vadd.f32 %v1658_v12, %v1160_v10  ;;  %v1621_v17 = vadd.f32 %v1620_v15, %v1531_v13 }
 0x2c9   : > { %1726 = vst [vmem:[#allocation3 + $0xf8] sm:$0xff] %v1694_v16  ;;  %v1679_v18 = vadd.f32 %v1621_v17, %v1145_v14 }
 0x2cb   : > { %1711 = vst [vmem:[#allocation3 + $0x8] sm:$0xff] %v1679_v18  ;;  %v1571_v19 = vpop.f32.mrf.mxu2 }
 0x2cc   : > { %v1660_v21 = vpop.f32.mrf.mxu3 }
 0x2cd   : > { %v1661_v22 = vadd.f32 %v1660_v21, %v1571_v19  ;;  %v1533_v23 = vpop.f32.mrf.mxu0 }
 0x2ce   : > { %v1622_v25 = vpop.f32.mrf.mxu1 }
 0x2cf   : > { %v1695_v26 = vadd.f32 %v1661_v22, %v1161_v20  ;;  %v1623_v27 = vadd.f32 %v1622_v25, %v1533_v23 }
 0x2d1   : > { %1727 = vst [vmem:[#allocation3 + $0x20] sm:$0xff] %v1695_v26  ;;  %v1680_v28 = vadd.f32 %v1623_v27, %v1146_v24 }
 0x2d3   : > { %1712 = vst [vmem:[#allocation3 + $0x78] sm:$0xff] %v1680_v28  ;;  %v1573_v29 = vpop.f32.mrf.mxu2 }
 0x2d4   : > { %v1662_v31 = vpop.f32.mrf.mxu3 }
 0x2d5   : > { %v1663_v32 = vadd.f32 %v1662_v31, %v1573_v29 }
 0x2d7   : > { %v1696_v33 = vadd.f32 %v1663_v32, %v1162_v30 }
 0x2d9   : > { %1728 = vst [vmem:[#allocation3 + $0x98] sm:$0xff] %v1696_v33 }
 0x2da PF: > { %p2659_p3 = scmp.ge.s32.totalorder %s3295_s3, 2 }
 0x2db   : > { %p1736_p6 = scmp.lt.s32.totalorder (!%p2659_p3), %s3295_s3, 0  ;;  %s1737_s15 = ssub.s32 (!%p2659_p3), 0, %s3295_s3 }
 0x2dc   : > { %1735 = sbr.rel (%p2659_p3) target bundleno = 756 (0x2f4), region = 76  ;;  %s2660_s13 = smin.u32 (!%p2659_p3), %s3295_s3, %s1737_s15 }
 0x2dd   : > { %s1739_s26 = sand.u32 (!%p2659_p3), 1, %s2660_s13  }
 0x2de   : > { %s1740_s23 = ssub.s32 (!%p2659_p3), 0, %s1739_s26 }
 0x2e1   : > { %v1742_v34 = vld [vmem:[#allocation3 + $0xb0] sm:$0xff]  ;;  %v1743_v35 = vld [vmem:[#allocation3] sm:$0xff]  ;;  %v1744_v36 = vld [vmem:[#allocation3 + $0xd8] sm:$0xff]  ;;  %s3751_s23 = smov (!%p1736_p6, %s1740_s23), %s1739_s26 }
 0x2e2   : > { %v1745_v37 = vld [vmem:[#allocation3 + $0x18] sm:$0xff]  ;;  %v1746_v38 = vld [vmem:[#allocation3 + $0x50] sm:$0xff]  ;;  %v1747_v39 = vld [vmem:[#allocation3 + $0x68] sm:$0xff]  ;;  %v2813_v40 = vpack.c.bf16 %v1743_v35, %v1742_v34  ;;  %s2801_s10 = sshll.u32 %s3751_s23, 7 }
 0x2e3   : > { %v1748_v41 = vld [vmem:[#allocation3 + $0x30] sm:$0xff]  ;;  %v1749_v42 = vld [vmem:[#allocation3 + $0x48] sm:$0xff]  ;;  %v2818_v43 = vpack.c.bf16 %v1745_v37, %v1744_v36  ;;  %v1750_v44 = vld [vmem:[#allocation3 + $0x80] sm:$0xff]  ;;  %v2823_v46 = vpack.c.bf16 %v1747_v39, %v1746_v38  ;;  %s3597_s20 = scalar_lea.vmem [#allocation2], %s2801_s10 }
 0x2e4   : > { %v1751_v45 = vld [vmem:[#allocation3 + $0x88] sm:$0xff]  ;;  %v1753_v48 = vld [vmem:[#allocation3 + $0xb8] sm:$0xff]  ;;  %v2828_v49 = vpack.c.bf16 %v1749_v42, %v1748_v41  ;;  %v1754_v50 = vld [vmem:[#allocation3 + $0x60] sm:$0xff]  ;;  %2814 = vst [vmem:[%s3597_s20] sm:$0xff] %v2813_v40  }
 0x2e5   : > { %v1752_v47 = vld [vmem:[#allocation3 + $0xe8] sm:$0xff]  ;;  %v1755_v51 = vld [vmem:[#allocation3 + $0xf0] sm:$0xff]  ;;  %v2833_v52 = vpack.c.bf16 %v1751_v45, %v1750_v44  ;;  %v1757_v54 = vld [vmem:[#allocation3 + $0x78] sm:$0xff]  ;;  %2890 = vst [vmem:[%s3597_s20 + $0x8] sm:$0xff] %v2818_v43  }
 0x2e6   : > { %v1756_v53 = vld [vmem:[#allocation3 + $0x8] sm:$0xff]  ;;  %v2838_v55 = vpack.c.bf16 %v1753_v48, %v1752_v47  ;;  %v1758_v56 = vld [vmem:[#allocation3 + $0x38] sm:$0xff]  ;;  %2891 = vst [vmem:[%s3597_s20 + $0x10] sm:$0xff] %v2823_v46   ;;  %v2843_v58 = vpack.c.bf16 %v1755_v51, %v1754_v50  ;;  %v1760_v59 = vld [vmem:[#allocation3 + $0x40] sm:$0xff] }
 0x2e7   : > { %v1759_v57 = vld [vmem:[#allocation3 + $0x58] sm:$0xff]  ;;  %v1761_v60 = vld [vmem:[#allocation3 + $0xc8] sm:$0xff]  ;;  %2892 = vst [vmem:[%s3597_s20 + $0x18] sm:$0xff] %v2828_v49   ;;  %v2848_v61 = vpack.c.bf16 %v1757_v54, %v1756_v53  ;;  %v1762_v62 = vld [vmem:[#allocation3 + $0xe0] sm:$0xff] }
 0x2e8   : > { %v1763_v63 = vld [vmem:[#allocation3 + $0x90] sm:$0xff]  ;;  %2893 = vst [vmem:[%s3597_s20 + $0x20] sm:$0xff] %v2833_v52   ;;  %v2853_v0 = vpack.c.bf16 %v1759_v57, %v1758_v56  ;;  %v1765_v2 = vld [vmem:[#allocation3 + $0xc0] sm:$0xff]  ;;  %v2858_v3 = vpack.c.bf16 %v1761_v60, %v1760_v59  ;;  %v1766_v4 = vld [vmem:[#allocation3 + $0xa8] sm:$0xff] }
 0x2e9   : > { %v1764_v1 = vld [vmem:[#allocation3 + $0x70] sm:$0xff]  ;;  %2894 = vst [vmem:[%s3597_s20 + $0x28] sm:$0xff] %v2838_v55   ;;  %v2863_v6 = vpack.c.bf16 %v1763_v63, %v1762_v62  ;;  %v1769_v8 = vld [vmem:[#allocation3 + $0x28] sm:$0xff]  ;;  %v1770_v10 = vld [vmem:[#allocation3 + $0xa0] sm:$0xff] }
 0x2ea   : > { %v1767_v5 = vld [vmem:[#allocation3 + $0xd0] sm:$0xff]  ;;  %2895 = vst [vmem:[%s3597_s20 + $0x30] sm:$0xff] %v2843_v58   ;;  %v2868_v9 = vpack.c.bf16 %v1765_v2, %v1764_v1  ;;  %v1771_v11 = vld [vmem:[#allocation3 + $0xf8] sm:$0xff]  ;;  %v1772_v13 = vld [vmem:[#allocation3 + $0x20] sm:$0xff] }
 0x2eb   : > { %v1768_v7 = vld [vmem:[#allocation3 + $0x10] sm:$0xff]  ;;  %2896 = vst [vmem:[%s3597_s20 + $0x38] sm:$0xff] %v2848_v61   ;;  %v2873_v12 = vpack.c.bf16 %v1767_v5, %v1766_v4  ;;  %v1773_v14 = vld [vmem:[#allocation3 + $0x98] sm:$0xff]  ;;  %v2883_v16 = vpack.c.bf16 %v1771_v11, %v1770_v10 }
 0x2ec   : > { %2897 = vst [vmem:[%s3597_s20 + $0x40] sm:$0xff] %v2853_v0   ;;  %v2878_v15 = vpack.c.bf16 %v1769_v8, %v1768_v7  ;;  %v2888_v17 = vpack.c.bf16 %v1773_v14, %v1772_v13 }
 0x2ed   : > { %2898 = vst [vmem:[%s3597_s20 + $0x48] sm:$0xff] %v2858_v3  }
 0x2ee   : > { %2899 = vst [vmem:[%s3597_s20 + $0x50] sm:$0xff] %v2863_v6  }
 0x2ef   : > { %2900 = vst [vmem:[%s3597_s20 + $0x58] sm:$0xff] %v2868_v9  }
 0x2f0   : > { %2901 = vst [vmem:[%s3597_s20 + $0x60] sm:$0xff] %v2873_v12  }
 0x2f1   : > { %2902 = vst [vmem:[%s3597_s20 + $0x68] sm:$0xff] %v2878_v15  }
 0x2f2   : > { %2903 = vst [vmem:[%s3597_s20 + $0x70] sm:$0xff] %v2883_v16  }
 0x2f3   : > { %2904 = vst [vmem:[%s3597_s20 + $0x78] sm:$0xff] %v2888_v17  }
 0x2f4 PF: > { %p2663_p7 = scmp.ne.s32.totalorder %s3295_s3, 2 }
 0x2f6   : > { %1845 = sbr.rel (%p2663_p7) target bundleno = 1176 (0x498), region = 80 }
 0x2fb   : > { %v2809_v18 = vld [vmem:[#allocation14 + $0x38] sm:$0xff]  ;;  %v2808_v19 = vld [vmem:[#allocation14 + $0x30] sm:$0xff]  ;;  %v2807_v20 = vld [vmem:[#allocation14 + $0x28] sm:$0xff] }
 0x2fc   : > { %1962 = vmatpush.bf16.msra.mxu0 %v2809_v18  ;;  %2939 = vmatpush.bf16.msra.mxu3 %v2809_v18  ;;  %v2806_v21 = vld [vmem:[#allocation14 + $0x20] sm:$0xff]  ;;  %v2805_v22 = vld [vmem:[#allocation14 + $0x18] sm:$0xff]  ;;  %v2804_v23 = vld [vmem:[#allocation14 + $0x10] sm:$0xff] }
 0x2fd   : > { %2938 = vmatpush.bf16.msra.mxu2 %v2809_v18  ;;  %2937 = vmatpush.bf16.msra.mxu1 %v2809_v18  ;;  %v2803_v24 = vld [vmem:[#allocation14 + $0x8] sm:$0xff]  ;;  %v2802_v25 = vld [vmem:[#allocation14] sm:$0xff]  ;;  %v1846_v26 = vld [vmem:[#allocation3 + $0xb0] sm:$0xff] }
 0x2fe   : > { %v1847_v27 = vld [vmem:[#allocation3] sm:$0xff]  ;;  %v1868_v28 = vld [vmem:[#allocation3 + $0x70] sm:$0xff]  ;;  %v1860_v30 = vld [vmem:[#allocation3 + $0x8] sm:$0xff] }
 0x2ff   : > { %v1869_v29 = vld [vmem:[#allocation3 + $0xc0] sm:$0xff]  ;;  %v1861_v31 = vld [vmem:[#allocation3 + $0x78] sm:$0xff]  ;;  %v1878_v32 = vpack.c.bf16 %v1847_v27, %v1846_v26  ;;  %v1856_v35 = vld [vmem:[#allocation3 + $0xe8] sm:$0xff] }
 0x300   : > { %1963 = vmatpush.bf16.msra.mxu0 %v2808_v19  ;;  %2942 = vmatpush.bf16.msra.mxu3 %v2808_v19  ;;  %v1889_v33 = vpack.c.bf16 %v1869_v29, %v1868_v28  ;;  %v1885_v34 = vpack.c.bf16 %v1861_v31, %v1860_v30  ;;  %v1857_v36 = vld [vmem:[#allocation3 + $0xb8] sm:$0xff]  ;;  %v1870_v40 = vld [vmem:[#allocation3 + $0xa8] sm:$0xff]  ;;  %v1871_v41 = vld [vmem:[#allocation3 + $0xd0] sm:$0xff] }
 0x301   : > { %2941 = vmatpush.bf16.msra.mxu2 %v2808_v19  ;;  %2940 = vmatpush.bf16.msra.mxu1 %v2808_v19  ;;  %v1883_v37 = vpack.c.bf16 %v1857_v36, %v1856_v35  ;;  %v1848_v38 = vld [vmem:[#allocation3 + $0xd8] sm:$0xff]  ;;  %v1890_v45 = vpack.c.bf16 %v1871_v41, %v1870_v40  ;;  %v1858_v47 = vld [vmem:[#allocation3 + $0x60] sm:$0xff]  ;;  %v1859_v48 = vld [vmem:[#allocation3 + $0xf0] sm:$0xff] }
 0x302   : > { %v1849_v39 = vld [vmem:[#allocation3 + $0x18] sm:$0xff]  ;;  %v1884_v49 = vpack.c.bf16 %v1859_v48, %v1858_v47  ;;  %v1850_v50 = vld [vmem:[#allocation3 + $0x50] sm:$0xff]  ;;  %v1851_v51 = vld [vmem:[#allocation3 + $0x68] sm:$0xff] }
 0x303   : > { %v1862_v42 = vld [vmem:[#allocation3 + $0x38] sm:$0xff]  ;;  %v1879_v44 = vpack.c.bf16 %v1849_v39, %v1848_v38  ;;  %v1872_v52 = vld [vmem:[#allocation3 + $0x10] sm:$0xff]  ;;  %v1873_v53 = vld [vmem:[#allocation3 + $0x28] sm:$0xff]  ;;  %v1880_v56 = vpack.c.bf16 %v1851_v51, %v1850_v50 }
 0x304   : > { %1964 = vmatpush.bf16.msra.mxu0 %v2807_v20  ;;  %2945 = vmatpush.bf16.msra.mxu3 %v2807_v20  ;;  %v1863_v43 = vld [vmem:[#allocation3 + $0x58] sm:$0xff]  ;;  %v1864_v54 = vld [vmem:[#allocation3 + $0x40] sm:$0xff]  ;;  %v1865_v55 = vld [vmem:[#allocation3 + $0xc8] sm:$0xff]  ;;  %v1891_v57 = vpack.c.bf16 %v1873_v53, %v1872_v52 }
 0x305   : > { %2944 = vmatpush.bf16.msra.mxu2 %v2807_v20  ;;  %2943 = vmatpush.bf16.msra.mxu1 %v2807_v20  ;;  %v1886_v46 = vpack.c.bf16 %v1863_v43, %v1862_v42  ;;  %v1887_v58 = vpack.c.bf16 %v1865_v55, %v1864_v54  ;;  %v1852_v59 = vld [vmem:[#allocation3 + $0x30] sm:$0xff]  ;;  %v1853_v60 = vld [vmem:[#allocation3 + $0x48] sm:$0xff]  ;;  %v1874_v61 = vld [vmem:[#allocation3 + $0xa0] sm:$0xff] }
 0x306   : > { %v1875_v62 = vld [vmem:[#allocation3 + $0xf8] sm:$0xff]  ;;  %v1866_v63 = vld [vmem:[#allocation3 + $0xe0] sm:$0xff]  ;;  %v1867_v0 = vld [vmem:[#allocation3 + $0x90] sm:$0xff]  ;;  %v1881_v1 = vpack.c.bf16 %v1853_v60, %v1852_v59 }
 0x307   : > { %v1892_v2 = vpack.c.bf16 %v1875_v62, %v1874_v61  ;;  %v1888_v3 = vpack.c.bf16 %v1867_v0, %v1866_v63  ;;  %v1854_v4 = vld [vmem:[#allocation3 + $0x80] sm:$0xff]  ;;  %v1855_v5 = vld [vmem:[#allocation3 + $0x88] sm:$0xff]  ;;  %v1877_v7 = vld [vmem:[#allocation3 + $0x98] sm:$0xff] }
 0x308   : > { %1965 = vmatpush.bf16.msra.mxu0 %v2806_v21  ;;  %2948 = vmatpush.bf16.msra.mxu3 %v2806_v21  ;;  %v1876_v6 = vld [vmem:[#allocation3 + $0x20] sm:$0xff]  ;;  %v1882_v8 = vpack.c.bf16 %v1855_v5, %v1854_v4 }
 0x309   : > { %2947 = vmatpush.bf16.msra.mxu2 %v2806_v21  ;;  %2946 = vmatpush.bf16.msra.mxu1 %v2806_v21  ;;  %v1893_v9 = vpack.c.bf16 %v1877_v7, %v1876_v6  ;;  %v3619_v11 = vld [vmem:[%s3706_s7] ss:$0 sm:$0xff] }
 0x30c   : > { %1966 = vmatpush.bf16.msra.mxu0 %v2805_v22  ;;  %2951 = vmatpush.bf16.msra.mxu3 %v2805_v22 }
 0x30d   : > { %2950 = vmatpush.bf16.msra.mxu2 %v2805_v22  ;;  %2949 = vmatpush.bf16.msra.mxu1 %v2805_v22 }
 0x310   : > { %1967 = vmatpush.bf16.msra.mxu0 %v2804_v23  ;;  %2954 = vmatpush.bf16.msra.mxu3 %v2804_v23 }
 0x311   : > { %2953 = vmatpush.bf16.msra.mxu2 %v2804_v23  ;;  %2952 = vmatpush.bf16.msra.mxu1 %v2804_v23 }
 0x314   : > { %1968 = vmatpush.bf16.msra.mxu0 %v2803_v24  ;;  %2957 = vmatpush.bf16.msra.mxu3 %v2803_v24 }
 0x315   : > { %2956 = vmatpush.bf16.msra.mxu2 %v2803_v24  ;;  %2955 = vmatpush.bf16.msra.mxu1 %v2803_v24 }
 0x318   : > { %1969 = vmatpush.bf16.msra.mxu0 %v2802_v25  ;;  %2960 = vmatpush.bf16.msra.mxu3 %v2802_v25 }
 0x319   : > { %2959 = vmatpush.bf16.msra.mxu2 %v2802_v25  ;;  %2958 = vmatpush.bf16.msra.mxu1 %v2802_v25 }
 0x31b   : > { %1970 = vmatmul.bf16.vlgmr.msra.gmra.mxu0 %v1878_v32  ;;  %2025 = vmatmul.bf16.vlgmr.msra.gmra.mxu3 %v1889_v33 }
 0x31c   : > { %2005 = vmatmul.bf16.vlgmr.msra.gmra.mxu2 %v1885_v34  ;;  %1995 = vmatmul.bf16.vlgmr.msra.gmra.mxu1 %v1883_v37 }
 0x32b   : > { %1975 = vmatmul.bf16.gmra.mxu0 %v1879_v44  ;;  %2030 = vmatmul.bf16.gmra.mxu3 %v1890_v45 }
 0x32c   : > { %2010 = vmatmul.bf16.gmra.mxu2 %v1886_v46  ;;  %2000 = vmatmul.bf16.gmra.mxu1 %v1884_v49 }
 0x33b   : > { %1980 = vmatmul.bf16.gmra.mxu0 %v1880_v56  ;;  %2035 = vmatmul.bf16.gmra.mxu3 %v1891_v57 }
 0x33c   : > { %2015 = vmatmul.bf16.gmra.mxu2 %v1887_v58 }
 0x34b   : > { %1985 = vmatmul.bf16.gmra.mxu0 %v1881_v1  ;;  %2040 = vmatmul.bf16.gmra.mxu3 %v1892_v2 }
 0x34c   : > { %2020 = vmatmul.bf16.gmra.mxu2 %v1888_v3 }
 0x35b   : > { %1990 = vmatmul.bf16.gmra.mxu0 %v1882_v8  ;;  %2045 = vmatmul.bf16.gmra.mxu3 %v1893_v9 }
 0x398   : > { %v1971_v10 = vpop.f32.mrf.mxu0 }
 0x399   : > { %v1996_v12 = vpop.f32.mrf.mxu1  ;;  %v1972_v13 = vadd.f32 %v3619_v11, %v1971_v10 }
 0x39a   : > { %v1997_v40 = vadd.f32 %v3619_v11, %v1996_v12 }
 0x39b   : > { %v2051_v17 = vmax.f32 %v1972_v13, 0.0 }
 0x39c   : > { %v2061_v47 = vmax.f32 %v1997_v40, 0.0  ;;  %v2100_v40 = vld [vmem:[%s3539_s17] sm:$0xff] }
 0x39e   : > { %v2026_v14 = vpop.f32.mrf.mxu3 }
 0x39f   : > { %v2006_v15 = vpop.f32.mrf.mxu2  ;;  %v2027_v22 = vadd.f32 %v3619_v11, %v2026_v14 }
 0x3a0   : > { %v1973_v16 = vpop.f32.mrf.mxu0  ;;  %v2007_v20 = vadd.f32 %v3619_v11, %v2006_v15 }
 0x3a1   : > { %v1974_v18 = vadd.f32 %v3619_v11, %v1973_v16  ;;  %v1998_v21 = vpop.f32.mrf.mxu1  ;;  %v2073_v30 = vmax.f32 %v2027_v22, 0.0 }
 0x3a2   : > { %v2065_v28 = vmax.f32 %v2007_v20, 0.0  ;;  %v1999_v41 = vadd.f32 %v3619_v11, %v1998_v21 }
 0x3a3   : > { %v2052_v19 = vmax.f32 %v1974_v18, 0.0 }
 0x3a4   : > { %v2062_v48 = vmax.f32 %v1999_v41, 0.0 }
 0x3a5   : > { %v3625_v23 = vpack.c.bf16 %v2052_v19, %v2051_v17 }
 0x3a6   : > { %v2028_v24 = vpop.f32.mrf.mxu3  ;;  %v2088_v50 = vpack.c.bf16 %v2062_v48, %v2061_v47 }
 0x3a7   : > { %v2029_v25 = vadd.f32 %v3619_v11, %v2028_v24  ;;  %v2008_v26 = vpop.f32.mrf.mxu2 }
 0x3a8   : > { %v1976_v27 = vpop.f32.mrf.mxu0  ;;  %v2009_v29 = vadd.f32 %v3619_v11, %v2008_v26 }
 0x3a9   : > { %v2074_v31 = vmax.f32 %v2029_v25, 0.0  ;;  %v2001_v34 = vpop.f32.mrf.mxu1  ;;  %v1977_v17 = vadd.f32 %v3619_v11, %v1976_v27 }
 0x3aa   : > { %v2066_v32 = vmax.f32 %v2009_v29, 0.0  ;;  %v2002_v38 = vadd.f32 %v3619_v11, %v2001_v34 }
 0x3ab   : > { %v3629_v33 = vpack.c.bf16 %v2074_v31, %v2073_v30  ;;  %v2053_v31 = vmax.f32 %v1977_v17, 0.0 }
 0x3ac   : > { %v2090_v35 = vpack.c.bf16 %v2066_v32, %v2065_v28  ;;  %v2063_v42 = vmax.f32 %v2002_v38, 0.0 }
 0x3ae   : > { %v3631_v36 = vpop.f32.mrf.mxu3  ;;  %2108 = vmatpush.bf16.msrb.mxu1 %v2090_v35 }
 0x3af   : > { %v3637_v53 = vpop.f32.mrf.mxu2  ;;  %v2032_v41 = vadd.f32 %v3619_v11, %v3631_v36 }
 0x3b0   : > { %v1978_v37 = vpop.f32.mrf.mxu0 }
 0x3b1   : > { %v2003_v39 = vpop.f32.mrf.mxu1  ;;  %v1979_v18 = vadd.f32 %v3619_v11, %v1978_v37 }
 0x3b2   : > { %v2004_v43 = vadd.f32 %v3619_v11, %v2003_v39 }
 0x3b3   : > { %v2054_v32 = vmax.f32 %v1979_v18, 0.0 }
 0x3b4   : > { %v2064_v45 = vmax.f32 %v2004_v43, 0.0 }
 0x3b5   : > { %v2084_v43 = vpack.c.bf16 %v2054_v32, %v2053_v31 }
 0x3b6   : > { %v2033_v44 = vpop.f32.mrf.mxu3  ;;  %v2089_v49 = vpack.c.bf16 %v2064_v45, %v2063_v42  ;;  %v2102_v45 = vunpack.c.l.b16 %v2100_v40 }
 0x3b7   : > { %v3639_v56 = vpop.f32.mrf.mxu2  ;;  %v2034_v37 = vadd.f32 %v3619_v11, %v2033_v44 }
 0x3b8   : > { %v1981_v46 = vpop.f32.mrf.mxu0  ;;  %2109 = vmatpush.bf16.msrb.mxu1 %v2089_v49  ;;  %v2075_v49 = vmax.f32 %v2032_v41, 0.0 }
 0x3b9   : > { %v1982_v7 = vadd.f32 %v3619_v11, %v1981_v46  ;;  %v2076_v46 = vmax.f32 %v2034_v37, 0.0 }
 0x3bb   : > { %v2055_v19 = vmax.f32 %v1982_v7, 0.0 }
 0x3bc   : > { %2110 = vmatpush.bf16.msrb.mxu1 %v2088_v50  ;;  %v2104_v50 = vpack.c.b16 %v2102_v45, %v2102_v45 }
 0x3be   : > { %v2036_v51 = vpop.f32.mrf.mxu3 }
 0x3bf   : > { %v3641_v60 = vpop.f32.mrf.mxu2  ;;  %v2037_v27 = vadd.f32 %v3619_v11, %v2036_v51  ;;  %v2095_v51 = vpack.c.bf16 %v2076_v46, %v2075_v49 }
 0x3c0   : > { %v1983_v52 = vpop.f32.mrf.mxu0  ;;  %v2017_v36 = vadd.f32 %v3619_v11, %v3641_v60  ;;  %v2103_v60 = vunpack.c.h.b16 %v2100_v40 }
 0x3c1   : > { %v1984_v8 = vadd.f32 %v3619_v11, %v1983_v52  ;;  %v2077_v42 = vmax.f32 %v2037_v27, 0.0 }
 0x3c3   : > { %v2056_v20 = vmax.f32 %v1984_v8, 0.0 }
 0x3c5   : > { %v2085_v35 = vpack.c.bf16 %v2056_v20, %v2055_v19 }
 0x3c6   : > { %v2038_v54 = vpop.f32.mrf.mxu3 }
 0x3c7   : > { %v2018_v1 = vpop.f32.mrf.mxu2  ;;  %v2039_v28 = vadd.f32 %v3619_v11, %v2038_v54 }
 0x3c8   : > { %v1986_v55 = vpop.f32.mrf.mxu0  ;;  %v2019_v54 = vadd.f32 %v3619_v11, %v2018_v1 }
 0x3c9   : > { %v1987_v2 = vadd.f32 %v3619_v11, %v1986_v55  ;;  %v2078_v38 = vmax.f32 %v2039_v28, 0.0 }
 0x3cb   : > { %v2057_v9 = vmax.f32 %v1987_v2, 0.0  ;;  %v2096_v47 = vpack.c.bf16 %v2078_v38, %v2077_v42 }
 0x3ce   : > { %v2041_v57 = vpop.f32.mrf.mxu3 }
 0x3cf   : > { %v2042_v21 = vadd.f32 %v3619_v11, %v2041_v57  ;;  %v2021_v26 = vpop.f32.mrf.mxu2 }
 0x3d0   : > { %v1988_v58 = vpop.f32.mrf.mxu0  ;;  %v2022_v44 = vadd.f32 %v3619_v11, %v2021_v26 }
 0x3d1   : > { %v1989_v3 = vadd.f32 %v3619_v11, %v1988_v58  ;;  %v2079_v34 = vmax.f32 %v2042_v21, 0.0  ;;  %v2012_v58 = vadd.f32 %v3619_v11, %v3637_v53 }
 0x3d2   : > { %v2071_v55 = vmax.f32 %v2022_v44, 0.0 }
 0x3d3   : > { %v2058_v10 = vmax.f32 %v1989_v3, 0.0  ;;  %v2105_v3 = vpack.c.b16 %v2103_v60, %v2103_v60 }
 0x3d5   : > { %v2086_v25 = vpack.c.bf16 %v2058_v10, %v2057_v9 }
 0x3d6   : > { %v2043_v59 = vpop.f32.mrf.mxu3 }
 0x3d7   : > { %v2044_v15 = vadd.f32 %v3619_v11, %v2043_v59  ;;  %v2023_v48 = vpop.f32.mrf.mxu2  ;;  %v2069_v59 = vmax.f32 %v2017_v36, 0.0 }
 0x3d8   : > { %v1991_v61 = vpop.f32.mrf.mxu0  ;;  %v2024_v52 = vadd.f32 %v3619_v11, %v2023_v48 }
 0x3d9   : > { %v1992_v62 = vadd.f32 %v3619_v11, %v1991_v61  ;;  %v2080_v29 = vmax.f32 %v2044_v15, 0.0  ;;  %v2070_v61 = vmax.f32 %v2019_v54, 0.0 }
 0x3da   : > { %v2072_v57 = vmax.f32 %v2024_v52, 0.0 }
 0x3db   : > { %v2059_v4 = vmax.f32 %v1992_v62, 0.0  ;;  %v2097_v39 = vpack.c.bf16 %v2080_v29, %v2079_v34  ;;  %v2092_v2 = vpack.c.bf16 %v2070_v61, %v2069_v59 }
 0x3dc   : > { %v2093_v62 = vpack.c.bf16 %v2072_v57, %v2071_v55 }
 0x3de   : > { %v2046_v63 = vpop.f32.mrf.mxu3 }
 0x3df   : > { %v2047_v12 = vadd.f32 %v3619_v11, %v2046_v63  ;;  %v2067_v63 = vmax.f32 %v2012_v58, 0.0 }
 0x3e0   : > { %v1993_v0 = vpop.f32.mrf.mxu0 }
 0x3e1   : > { %v1994_v5 = vadd.f32 %v3619_v11, %v1993_v0  ;;  %v2081_v22 = vmax.f32 %v2047_v12, 0.0 }
 0x3e3   : > { %v2060_v6 = vmax.f32 %v1994_v5, 0.0  ;;  %v2099_v5 = vld [vmem:[#allocation15] sm:$0xff] }
 0x3e5   : > { %v2087_v13 = vpack.c.bf16 %v2060_v6, %v2059_v4 }
 0x3e6   : > { %v2048_v14 = vpop.f32.mrf.mxu3 }
 0x3e7   : > { %v2049_v16 = vadd.f32 %v3619_v11, %v2048_v14  ;;  %2111 = vmatpush.bf16.msrb.mxu1 %v2087_v13 }
 0x3e9   : > { %v2082_v24 = vmax.f32 %v2049_v16, 0.0 }
 0x3eb   : > { %2112 = vmatpush.bf16.msrb.mxu1 %v2086_v25  ;;  %v2098_v30 = vpack.c.bf16 %v2082_v24, %v2081_v22 }
 0x3ed   : > { %2121 = vmatpush.bf16.msrb.mxu2 %v2098_v30 }
 0x3ef   : > { %2113 = vmatpush.bf16.msrb.mxu1 %v2085_v35 }
 0x3f1   : > { %2122 = vmatpush.bf16.msrb.mxu2 %v2097_v39 }
 0x3f3   : > { %2114 = vmatpush.bf16.msrb.mxu1 %v2084_v43 }
 0x3f5   : > { %2123 = vmatpush.bf16.msrb.mxu2 %v2096_v47 }
 0x3f7   : > { %2115 = vmatpush.bf16.msrb.mxu1 %v3625_v23  ;;  %v2014_v23 = vadd.f32 %v3619_v11, %v3639_v56 }
 0x3f9   : > { %2124 = vmatpush.bf16.msrb.mxu2 %v2095_v51  ;;  %v2068_v0 = vmax.f32 %v2014_v23, 0.0 }
 0x3fa   : > { %2116 = vmatmul.bf16.vlgmr.msrb.gmra.mxu1 %v2104_v50 }
 0x3fb   : > { %v2091_v1 = vpack.c.bf16 %v2068_v0, %v2067_v63 }
 0x3fd   : > { %2125 = vmatpush.bf16.msrb.mxu2 %v3629_v33 }
 0x401   : > { %2126 = vmatpush.bf16.msrb.mxu2 %v2093_v62 }
 0x405   : > { %2127 = vmatpush.bf16.msrb.mxu2 %v2092_v2 }
 0x409   : > { %2128 = vmatpush.bf16.msrb.mxu2 %v2091_v1 }
 0x40c   : > { %2129 = vmatmul.bf16.vlgmr.msrb.gmra.mxu2 %v2105_v3 }
 0x477   : > { %v2117_v33 = vpop.f32.mrf.mxu1 }
 0x47f   : > { %v2119_v4 = vpop.f32.mrf.mxu1 }
 0x48f   : > { %v2130_v53 = vpop.f32.mrf.mxu2 }
 0x490   : > { %v2131_v6 = vadd.f32 %v2130_v53, %v2117_v33 }
 0x492   : > { %v2134_v7 = vadd.f32 %v2131_v6, %v2099_v5 }
 0x494   : > { %2135 = vst [vmem:[#allocation15] sm:$0xff] %v2134_v7 }
 0x497   : > { %v2132_v11 = vpop.f32.mrf.mxu2 }
 0x498 PF: > { %s3730_s19 = sadd.s32 4294967295, %s3303_s24   ;;  %s2144_s29 = sshll.u32 %s3708_s9, 4  ;;  %s2145_s29 = int_to_ptr.hbm [resolvable:$true] %s2144_s29 }
 0x499   : > { %p2991_p8 = scmp.eq.s32.totalorder %s3730_s19, 2  ;;  %s3315_s17 = smov [#allocation15]  }
 0x49a   : > { %s2142_s27 = sshll.u32 %s3315_s17, 4  ;;  %s2143_s27 = int_to_ptr.vmem [resolvable:$true] %s2142_s27 }
 0x49b   : > { %2972 = dma.vmem_to_hbm [thread:$0]  (%p2991_p8), %s2143_s27, 128, %s2145_s29, [#allocation11]  }
 0x49c   : > { %3270 = dma.done.wait (%p2991_p8), [#allocation11], 128  }
 0x49d   : > { %3272 = vsyncadd (%p2991_p8), [#allocation11], 4294967168 }
 0x49e PF: > { %s39_s24 = sadd.s32 1, %s3303_s24   ;;  %s3731_s16 = smov %s3495_s2 }
 0x49f   : > { %p36_p9 = scmp.ge.s32.totalorder %s39_s24, 5   ;;  %s3732_s3 = sld [smem:[#allocation23_spill]] }
 0x4a0   : > { %s3733_s23 = sld [smem:[#allocation24_spill]]  ;;  %s3734_s0 = smov %s3279_s1 }
 0x4a1   : > { %s3681_s1 = smov 0   ;;  %s3735_s2 = smov %s3287_s21 }
 0x4a2   : > { %s3736_s21 = smov %s3291_s22  ;;  %s3737_s22 = smov %s3731_s16 }
 0x4a3   :  { %38 = sbr.rel (!%p36_p9) target bundleno = 17 (0x11), region = 119 }
 0x4a8   :  { %2158 = vsyncpa [#allocation10], 1 }
 0x4a9   :  { %2160 = vsyncpa [#allocation10 + $0x1], 1 }
 0x4aa   :  { %2161 = vsyncpa [#allocation13], 1 }
 0x4ab   :  { %2162 = vsyncpa [#allocation11], 1 }
 0x4ac   :  { %2164 = vsyncpa [#allocation11 + $0x1], 1 }

</bundles_post_ra>
